<compile_context>
chip_gen: v7x
topology: tpu7x:2x2x1
jax: 0.10.0
libtpu: 0.0.40
codegen_flags: <defaults>
</compile_context>

<pallas_src>
import functools

import jax
import jax.numpy as jnp
from jax.experimental import pallas as pl
from jax.experimental.pallas import tpu as pltpu


def decoder_kernel(x_ref, wqkv_ref, fr_ref, ffw_ref, ffb_ref,
                   g1_ref, b1_ref, g2_ref, b2_ref, out_ref,
                   *, batch, seq, heads, head_dim):
    B, T, H, D = batch, seq, heads, head_dim
    E = H * D
    inv_n = 1.0 / float(T * E)

    x = x_ref[...]                                            # (B*T, E) f32

    # ---- fused Q/K/V projection: one lane-dense (B*T, E) x (E, 128) matmul.
    # Kept in f32: it feeds the sign-sensitive masked score path.
    qkv = jnp.dot(x, wqkv_ref[...],
                  preferred_element_type=jnp.float32)         # (B*T, >=3E)

    # ---- multiplicative causal mask with 1/sqrt(D) folded in --------------
    #      softmax((s * (-1e9*triu + 1)) / sqrt(D)) == softmax(s * mask)
    row = jax.lax.broadcasted_iota(jnp.int32, (T, T), 0)
    col = jax.lax.broadcasted_iota(jnp.int32, (T, T), 1)
    upper = (col > row).astype(jnp.float32)
    inv_scale = 1.0 / (float(D) ** 0.5)
    mask = (-1000000000.0 * upper + 1.0) * inv_scale

    g1 = g1_ref[...]; b1 = b1_ref[...]
    g2 = g2_ref[...]; b2 = b2_ref[...]
    ffw = ffw_ref[...]                                        # (E, E) bf16
    ffb = ffb_ref[...]                                        # (1, E) f32

    # contract last dim of q with last dim of k (q @ k.T, no XLU transpose)
    score_dims = (((1,), (1,)), ((), ()))

    z1_blocks = []
    for b in range(B):
        r0 = b * T
        fr_b = fr_ref[b]                                      # (E, E) f32
        # residual folded into the accumulator; feature-reduction fused into
        # the per-head loop -> no attention-output VMEM scratch round trip.
        acc = x[r0:r0 + T, :]                                 # (T, E)
        for h in range(H):
            c0 = h * D
            qh = qkv[r0:r0 + T, c0:c0 + D]                    # (T, D)
            kh = qkv[r0:r0 + T, E + c0:E + c0 + D]            # (T, D)
            vh = qkv[r0:r0 + T, 2 * E + c0:2 * E + c0 + D]    # (T, D)

            s = jax.lax.dot_general(qh, kh, score_dims,
                                    preferred_element_type=jnp.float32)
            logits = s * mask                                 # (T, T)
            m = jnp.max(logits, axis=-1, keepdims=True)
            p = jnp.exp(logits - m)
            attn = p * pl.reciprocal(jnp.sum(p, axis=-1, keepdims=True),
                                     approx=True)

            zh = jnp.dot(attn.astype(jnp.bfloat16),
                         vh.astype(jnp.bfloat16),
                         preferred_element_type=jnp.float32)  # (T, D)
            acc = acc + jnp.dot(zh.astype(jnp.bfloat16),
                                fr_b[c0:c0 + D, :].astype(jnp.bfloat16),
                                preferred_element_type=jnp.float32)

        # ---- LayerNorm([T, E]) #1: one-pass mean / E[x^2]-mu^2 variance ---
        mu1 = jnp.sum(acc) * inv_n
        var1 = jnp.sum(acc * acc) * inv_n - mu1 * mu1
        z1_blocks.append((acc - mu1) * jax.lax.rsqrt(var1 + 1e-5) * g1 + b1)

    z1 = jnp.concatenate(z1_blocks, axis=0)                   # (B*T, E)

    # ---- feed forward on the whole slab (weight pre-transposed, bf16) -----
    ff = jnp.dot(z1.astype(jnp.bfloat16), ffw,
                 preferred_element_type=jnp.float32) + ffb
    h2 = z1 + jnp.maximum(ff, 0.0)

    # ---- LayerNorm([T, E]) #2, assembled and stored once ------------------
    out_blocks = []
    for b in range(B):
        r0 = b * T
        h2b = h2[r0:r0 + T, :]
        mu2 = jnp.sum(h2b) * inv_n
        var2 = jnp.sum(h2b * h2b) * inv_n - mu2 * mu2
        out_blocks.append((h2b - mu2) * jax.lax.rsqrt(var2 + 1e-5) * g2 + b2)
    out_ref[...] = jnp.concatenate(out_blocks, axis=0)


def decoder_forward(x, params, *, num_heads):
    B, T, E = x.shape
    D = E // num_heads
    wq, wk, wv, fr, ffw, ffb, g1, b1, g2, b2 = params

    # pack (H, E, D) -> (E, H*D) so head h occupies columns [h*D, (h+1)*D)
    def pack(w):
        return jnp.transpose(w, (1, 0, 2)).reshape(E, num_heads * D)

    w_qkv = jnp.concatenate([pack(wq), pack(wk), pack(wv)], axis=-1)  # (E, 3E)
    lane_pad = (-w_qkv.shape[1]) % 128          # pad to a full 128-lane tile
    if lane_pad:
        w_qkv = jnp.pad(w_qkv, ((0, 0), (0, lane_pad)))
    ffw_t = ffw.T.astype(jnp.bfloat16)          # nn.Linear (out,in) -> (in,out)
    ffb2 = ffb.reshape(1, E)
    x2d = x.reshape(B * T, E)

    kernel = functools.partial(decoder_kernel, batch=B, seq=T,
                               heads=num_heads, head_dim=D)
    vmem = lambda: pl.BlockSpec(memory_space=pltpu.MemorySpace.VMEM)

    out2d = pl.pallas_call(
        kernel,
        out_shape=jax.ShapeDtypeStruct((B * T, E), jnp.float32),
        in_specs=[vmem() for _ in range(9)],
        out_specs=vmem(),
    )(x2d, w_qkv, fr, ffw_t, ffb2, g1, b1, g2, b2)
    return out2d.reshape(B, T, E)


def decoder_reference(x, params, *, num_heads):
    """Pure-JAX mirror of the PyTorch forward, used for correctness check."""
    B, T, E = x.shape
    D = E // num_heads
    wq, wk, wv, fr, ffw, ffb, g1, b1, g2, b2 = params

    def get_qkv(w):
        qkv = jnp.tensordot(x, w, axes=([2], [1]))        # (B, T, H, D)
        qkv = jnp.swapaxes(qkv, 1, 2)                     # (B, H, T, D)
        return qkv.reshape(B * num_heads, T, D)

    q, k, v = get_qkv(wq), get_qkv(wk), get_qkv(wv)
    s = jnp.einsum('btd,bsd->bts', q, k)
    ones = jnp.ones_like(s)
    mask = -1000000000.0 * jnp.triu(ones, k=1) + ones
    s = s * mask
    attn = jax.nn.softmax(s / (float(D) ** 0.5), axis=2)
    z = jnp.einsum('bts,bsd->btd', attn, v)
    z = z.reshape(B, num_heads, T, D)
    z = jnp.swapaxes(z, 1, 2).reshape(B, T, E)
    z = jnp.einsum('bte,bef->btf', z, fr)

    h1 = x + z
    mu1 = jnp.mean(h1, axis=(1, 2), keepdims=True)
    var1 = jnp.mean((h1 - mu1) ** 2, axis=(1, 2), keepdims=True)
    z1 = (h1 - mu1) / jnp.sqrt(var1 + 1e-5) * g1 + b1

    ff = jnp.einsum('bte,oe->bto', z1, ffw) + ffb[0]
    z2 = jnp.maximum(ff, 0.0)

    h2 = z1 + z2
    mu2 = jnp.mean(h2, axis=(1, 2), keepdims=True)
    var2 = jnp.mean((h2 - mu2) ** 2, axis=(1, 2), keepdims=True)
    return (h2 - mu2) / jnp.sqrt(var2 + 1e-5) * g2 + b2


if __name__ == "__main__":
    # EMBEDDING_SIZE=32, CONTEXT_LENGTH=8, BATCH_SIZE=2, NUM_HEADS=4
    B, T, E, H = 2, 8, 32, 4
    D = E // H

    key = jax.random.PRNGKey(0)
    keys = jax.random.split(key, 11)
    scale = 0.1
    x = jax.random.normal(keys[0], (B, T, E), jnp.float32)
    wq = scale * jax.random.normal(keys[1], (H, E, D), jnp.float32)
    wk = scale * jax.random.normal(keys[2], (H, E, D), jnp.float32)
    wv = scale * jax.random.normal(keys[3], (H, E, D), jnp.float32)
    fr = scale * jax.random.normal(keys[4], (B, E, E), jnp.float32)
    ffw = scale * jax.random.normal(keys[5], (E, E), jnp.float32)   # nn.Linear weight (out, in)
    ffb = scale * jax.random.normal(keys[6], (1, E), jnp.float32)   # nn.Linear bias
    g1 = 1.0 + 0.1 * jax.random.normal(keys[7], (T, E), jnp.float32)
    b1 = 0.1 * jax.random.normal(keys[8], (T, E), jnp.float32)
    g2 = 1.0 + 0.1 * jax.random.normal(keys[9], (T, E), jnp.float32)
    b2 = 0.1 * jax.random.normal(keys[10], (T, E), jnp.float32)
    params = (wq, wk, wv, fr, ffw, ffb, g1, b1, g2, b2)

    out = decoder_forward(x, params, num_heads=H)
    out = jax.block_until_ready(out)

    with jax.default_matmul_precision("highest"):
        ref = decoder_reference(x, params, num_heads=H)
    ref = jax.block_until_ready(ref)

    assert out.shape == (B, T, E)
    # Tolerance relaxed vs the pure-f32 version: bf16 operands on the
    # sign-insensitive matmuls (per the perf review) bound max-abs error at
    # roughly the 1e-2 level on these unit-scale LayerNorm outputs; real
    # structural bugs would show up as O(0.1..1) errors.
    err = float(jnp.max(jnp.abs(out - ref)))
    assert err < 2e-2, f"max abs err {err}"
    print("KERNEL_OK")
</pallas_src>

<mosaic_0001>
module attributes {stable_mosaic.version = 11 : i64} {
  func.func @decoder_kernel(%arg0: memref<16x32xf32, #tpu.memory_space<vmem>>, %arg1: memref<32x128xf32, #tpu.memory_space<vmem>>, %arg2: memref<2x32x32xf32, #tpu.memory_space<vmem>>, %arg3: memref<32x32xbf16, #tpu.memory_space<vmem>>, %arg4: memref<1x32xf32, #tpu.memory_space<vmem>>, %arg5: memref<8x32xf32, #tpu.memory_space<vmem>>, %arg6: memref<8x32xf32, #tpu.memory_space<vmem>>, %arg7: memref<8x32xf32, #tpu.memory_space<vmem>>, %arg8: memref<8x32xf32, #tpu.memory_space<vmem>>, %arg9: memref<16x32xf32, #tpu.memory_space<vmem>>) attributes {dimension_semantics = [], scalar_prefetch = 0 : i64, scratch_operands = 0 : i64, tpu.core_type = #tpu.core_type<tc>} {
    %c0 = arith.constant 0 : index
    %c0_0 = arith.constant 0 : index
    %0 = vector.load %arg0[%c0, %c0_0] : memref<16x32xf32, #tpu.memory_space<vmem>>, vector<16x32xf32>
    %c0_1 = arith.constant 0 : index
    %c0_2 = arith.constant 0 : index
    %1 = vector.load %arg1[%c0_1, %c0_2] : memref<32x128xf32, #tpu.memory_space<vmem>>, vector<32x128xf32>
    %cst = arith.constant dense<0.000000e+00> : vector<16x128xf32>
    %2 = tpu.matmul %0, %1, %cst {dimension_numbers = #tpu.dot_dimension_numbers<[1], [0], [0], [1], [0, 0, 1, 1], [], []>} : vector<16x32xf32>, vector<32x128xf32>, vector<16x128xf32> -> vector<16x128xf32>
    %3 = tpu.iota {dimensions = array<i32: 0>} : vector<8x8xi32>
    %4 = tpu.iota {dimensions = array<i32: 1>} : vector<8x8xi32>
    %5 = arith.cmpi sgt, %4, %3 : vector<8x8xi32>
    %6 = arith.extui %5 : vector<8x8xi1> to vector<8x8xi32>
    %7 = arith.sitofp %6 : vector<8x8xi32> to vector<8x8xf32>
    %cst_3 = arith.constant -1.000000e+09 : f32
    %8 = vector.broadcast %cst_3 : f32 to vector<8x8xf32>
    %9 = arith.mulf %8, %7 : vector<8x8xf32>
    %cst_4 = arith.constant 1.000000e+00 : f32
    %10 = vector.broadcast %cst_4 : f32 to vector<8x8xf32>
    %11 = arith.addf %9, %10 : vector<8x8xf32>
    %cst_5 = arith.constant 0.353553385 : f32
    %12 = vector.broadcast %cst_5 : f32 to vector<8x8xf32>
    %13 = arith.mulf %11, %12 : vector<8x8xf32>
    %c0_6 = arith.constant 0 : index
    %c0_7 = arith.constant 0 : index
    %14 = vector.load %arg5[%c0_6, %c0_7] : memref<8x32xf32, #tpu.memory_space<vmem>>, vector<8x32xf32>
    %c0_8 = arith.constant 0 : index
    %c0_9 = arith.constant 0 : index
    %15 = vector.load %arg6[%c0_8, %c0_9] : memref<8x32xf32, #tpu.memory_space<vmem>>, vector<8x32xf32>
    %c0_10 = arith.constant 0 : index
    %c0_11 = arith.constant 0 : index
    %16 = vector.load %arg7[%c0_10, %c0_11] : memref<8x32xf32, #tpu.memory_space<vmem>>, vector<8x32xf32>
    %c0_12 = arith.constant 0 : index
    %c0_13 = arith.constant 0 : index
    %17 = vector.load %arg8[%c0_12, %c0_13] : memref<8x32xf32, #tpu.memory_space<vmem>>, vector<8x32xf32>
    %c0_14 = arith.constant 0 : index
    %c0_15 = arith.constant 0 : index
    %18 = vector.load %arg3[%c0_14, %c0_15] : memref<32x32xbf16, #tpu.memory_space<vmem>>, vector<32x32xbf16>
    %c0_16 = arith.constant 0 : index
    %c0_17 = arith.constant 0 : index
    %19 = vector.load %arg4[%c0_16, %c0_17] : memref<1x32xf32, #tpu.memory_space<vmem>>, vector<1x32xf32>
    %c0_18 = arith.constant 0 : index
    %c0_19 = arith.constant 0 : index
    %c0_20 = arith.constant 0 : index
    %20 = vector.load %arg2[%c0_18, %c0_19, %c0_20] : memref<2x32x32xf32, #tpu.memory_space<vmem>>, vector<1x32x32xf32>
    %21 = vector.shape_cast %20 : vector<1x32x32xf32> to vector<32x32xf32>
    %22 = vector.extract_strided_slice %0 {offsets = [0, 0], sizes = [8, 32], strides = [1, 1]} : vector<16x32xf32> to vector<8x32xf32>
    %23 = vector.extract_strided_slice %2 {offsets = [0, 0], sizes = [8, 8], strides = [1, 1]} : vector<16x128xf32> to vector<8x8xf32>
    %24 = vector.extract_strided_slice %2 {offsets = [0, 32], sizes = [8, 8], strides = [1, 1]} : vector<16x128xf32> to vector<8x8xf32>
    %25 = vector.extract_strided_slice %2 {offsets = [0, 64], sizes = [8, 8], strides = [1, 1]} : vector<16x128xf32> to vector<8x8xf32>
    %cst_21 = arith.constant dense<0.000000e+00> : vector<8x8xf32>
    %26 = tpu.matmul %23, %24, %cst_21 {dimension_numbers = #tpu.dot_dimension_numbers<[1], [1], [0], [0], [0, 0, 1, 0], [], []>} : vector<8x8xf32>, vector<8x8xf32>, vector<8x8xf32> -> vector<8x8xf32>
    %27 = arith.mulf %26, %13 : vector<8x8xf32>
    %cst_22 = arith.constant dense<0xFF800000> : vector<8xf32>
    %28 = vector.multi_reduction <maximumf>, %27, %cst_22 [1] : vector<8x8xf32> to vector<8xf32>
    %29 = vector.shape_cast %28 : vector<8xf32> to vector<8x1xf32>
    %30 = vector.broadcast %29 : vector<8x1xf32> to vector<8x8xf32>
    %31 = arith.subf %27, %30 : vector<8x8xf32>
    %32 = math.exp %31 : vector<8x8xf32>
    %cst_23 = arith.constant dense<0.000000e+00> : vector<8xf32>
    %33 = vector.multi_reduction <add>, %32, %cst_23 [1] : vector<8x8xf32> to vector<8xf32>
    %34 = vector.shape_cast %33 : vector<8xf32> to vector<8x1xf32>
    %35 = tpu.reciprocal %34 {approx = true} : vector<8x1xf32> -> vector<8x1xf32>
    %36 = vector.broadcast %35 : vector<8x1xf32> to vector<8x8xf32>
    %37 = arith.mulf %32, %36 : vector<8x8xf32>
    %38 = arith.truncf %37 : vector<8x8xf32> to vector<8x8xbf16>
    %39 = arith.truncf %25 : vector<8x8xf32> to vector<8x8xbf16>
    %cst_24 = arith.constant dense<0.000000e+00> : vector<8x8xf32>
    %40 = tpu.matmul %38, %39, %cst_24 {dimension_numbers = #tpu.dot_dimension_numbers<[1], [0], [0], [1], [0, 0, 1, 1], [], []>} : vector<8x8xbf16>, vector<8x8xbf16>, vector<8x8xf32> -> vector<8x8xf32>
    %41 = arith.truncf %40 : vector<8x8xf32> to vector<8x8xbf16>
    %42 = vector.extract_strided_slice %21 {offsets = [0, 0], sizes = [8, 32], strides = [1, 1]} : vector<32x32xf32> to vector<8x32xf32>
    %43 = arith.truncf %42 : vector<8x32xf32> to vector<8x32xbf16>
    %cst_25 = arith.constant dense<0.000000e+00> : vector<8x32xf32>
    %44 = tpu.matmul %41, %43, %cst_25 {dimension_numbers = #tpu.dot_dimension_numbers<[1], [0], [0], [1], [0, 0, 1, 1], [], []>} : vector<8x8xbf16>, vector<8x32xbf16>, vector<8x32xf32> -> vector<8x32xf32>
    %45 = arith.addf %22, %44 : vector<8x32xf32>
    %46 = vector.extract_strided_slice %2 {offsets = [0, 8], sizes = [8, 8], strides = [1, 1]} : vector<16x128xf32> to vector<8x8xf32>
    %47 = vector.extract_strided_slice %2 {offsets = [0, 40], sizes = [8, 8], strides = [1, 1]} : vector<16x128xf32> to vector<8x8xf32>
    %48 = vector.extract_strided_slice %2 {offsets = [0, 72], sizes = [8, 8], strides = [1, 1]} : vector<16x128xf32> to vector<8x8xf32>
    %cst_26 = arith.constant dense<0.000000e+00> : vector<8x8xf32>
    %49 = tpu.matmul %46, %47, %cst_26 {dimension_numbers = #tpu.dot_dimension_numbers<[1], [1], [0], [0], [0, 0, 1, 0], [], []>} : vector<8x8xf32>, vector<8x8xf32>, vector<8x8xf32> -> vector<8x8xf32>
    %50 = arith.mulf %49, %13 : vector<8x8xf32>
    %cst_27 = arith.constant dense<0xFF800000> : vector<8xf32>
    %51 = vector.multi_reduction <maximumf>, %50, %cst_27 [1] : vector<8x8xf32> to vector<8xf32>
    %52 = vector.shape_cast %51 : vector<8xf32> to vector<8x1xf32>
    %53 = vector.broadcast %52 : vector<8x1xf32> to vector<8x8xf32>
    %54 = arith.subf %50, %53 : vector<8x8xf32>
    %55 = math.exp %54 : vector<8x8xf32>
    %cst_28 = arith.constant dense<0.000000e+00> : vector<8xf32>
    %56 = vector.multi_reduction <add>, %55, %cst_28 [1] : vector<8x8xf32> to vector<8xf32>
    %57 = vector.shape_cast %56 : vector<8xf32> to vector<8x1xf32>
    %58 = tpu.reciprocal %57 {approx = true} : vector<8x1xf32> -> vector<8x1xf32>
    %59 = vector.broadcast %58 : vector<8x1xf32> to vector<8x8xf32>
    %60 = arith.mulf %55, %59 : vector<8x8xf32>
    %61 = arith.truncf %60 : vector<8x8xf32> to vector<8x8xbf16>
    %62 = arith.truncf %48 : vector<8x8xf32> to vector<8x8xbf16>
    %cst_29 = arith.constant dense<0.000000e+00> : vector<8x8xf32>
    %63 = tpu.matmul %61, %62, %cst_29 {dimension_numbers = #tpu.dot_dimension_numbers<[1], [0], [0], [1], [0, 0, 1, 1], [], []>} : vector<8x8xbf16>, vector<8x8xbf16>, vector<8x8xf32> -> vector<8x8xf32>
    %64 = arith.truncf %63 : vector<8x8xf32> to vector<8x8xbf16>
    %65 = vector.extract_strided_slice %21 {offsets = [8, 0], sizes = [8, 32], strides = [1, 1]} : vector<32x32xf32> to vector<8x32xf32>
    %66 = arith.truncf %65 : vector<8x32xf32> to vector<8x32xbf16>
    %cst_30 = arith.constant dense<0.000000e+00> : vector<8x32xf32>
    %67 = tpu.matmul %64, %66, %cst_30 {dimension_numbers = #tpu.dot_dimension_numbers<[1], [0], [0], [1], [0, 0, 1, 1], [], []>} : vector<8x8xbf16>, vector<8x32xbf16>, vector<8x32xf32> -> vector<8x32xf32>
    %68 = arith.addf %45, %67 : vector<8x32xf32>
    %69 = vector.extract_strided_slice %2 {offsets = [0, 16], sizes = [8, 8], strides = [1, 1]} : vector<16x128xf32> to vector<8x8xf32>
    %70 = vector.extract_strided_slice %2 {offsets = [0, 48], sizes = [8, 8], strides = [1, 1]} : vector<16x128xf32> to vector<8x8xf32>
    %71 = vector.extract_strided_slice %2 {offsets = [0, 80], sizes = [8, 8], strides = [1, 1]} : vector<16x128xf32> to vector<8x8xf32>
    %cst_31 = arith.constant dense<0.000000e+00> : vector<8x8xf32>
    %72 = tpu.matmul %69, %70, %cst_31 {dimension_numbers = #tpu.dot_dimension_numbers<[1], [1], [0], [0], [0, 0, 1, 0], [], []>} : vector<8x8xf32>, vector<8x8xf32>, vector<8x8xf32> -> vector<8x8xf32>
    %73 = arith.mulf %72, %13 : vector<8x8xf32>
    %cst_32 = arith.constant dense<0xFF800000> : vector<8xf32>
    %74 = vector.multi_reduction <maximumf>, %73, %cst_32 [1] : vector<8x8xf32> to vector<8xf32>
    %75 = vector.shape_cast %74 : vector<8xf32> to vector<8x1xf32>
    %76 = vector.broadcast %75 : vector<8x1xf32> to vector<8x8xf32>
    %77 = arith.subf %73, %76 : vector<8x8xf32>
    %78 = math.exp %77 : vector<8x8xf32>
    %cst_33 = arith.constant dense<0.000000e+00> : vector<8xf32>
    %79 = vector.multi_reduction <add>, %78, %cst_33 [1] : vector<8x8xf32> to vector<8xf32>
    %80 = vector.shape_cast %79 : vector<8xf32> to vector<8x1xf32>
    %81 = tpu.reciprocal %80 {approx = true} : vector<8x1xf32> -> vector<8x1xf32>
    %82 = vector.broadcast %81 : vector<8x1xf32> to vector<8x8xf32>
    %83 = arith.mulf %78, %82 : vector<8x8xf32>
    %84 = arith.truncf %83 : vector<8x8xf32> to vector<8x8xbf16>
    %85 = arith.truncf %71 : vector<8x8xf32> to vector<8x8xbf16>
    %cst_34 = arith.constant dense<0.000000e+00> : vector<8x8xf32>
    %86 = tpu.matmul %84, %85, %cst_34 {dimension_numbers = #tpu.dot_dimension_numbers<[1], [0], [0], [1], [0, 0, 1, 1], [], []>} : vector<8x8xbf16>, vector<8x8xbf16>, vector<8x8xf32> -> vector<8x8xf32>
    %87 = arith.truncf %86 : vector<8x8xf32> to vector<8x8xbf16>
    %88 = vector.extract_strided_slice %21 {offsets = [16, 0], sizes = [8, 32], strides = [1, 1]} : vector<32x32xf32> to vector<8x32xf32>
    %89 = arith.truncf %88 : vector<8x32xf32> to vector<8x32xbf16>
    %cst_35 = arith.constant dense<0.000000e+00> : vector<8x32xf32>
    %90 = tpu.matmul %87, %89, %cst_35 {dimension_numbers = #tpu.dot_dimension_numbers<[1], [0], [0], [1], [0, 0, 1, 1], [], []>} : vector<8x8xbf16>, vector<8x32xbf16>, vector<8x32xf32> -> vector<8x32xf32>
    %91 = arith.addf %68, %90 : vector<8x32xf32>
    %92 = vector.extract_strided_slice %2 {offsets = [0, 24], sizes = [8, 8], strides = [1, 1]} : vector<16x128xf32> to vector<8x8xf32>
    %93 = vector.extract_strided_slice %2 {offsets = [0, 56], sizes = [8, 8], strides = [1, 1]} : vector<16x128xf32> to vector<8x8xf32>
    %94 = vector.extract_strided_slice %2 {offsets = [0, 88], sizes = [8, 8], strides = [1, 1]} : vector<16x128xf32> to vector<8x8xf32>
    %cst_36 = arith.constant dense<0.000000e+00> : vector<8x8xf32>
    %95 = tpu.matmul %92, %93, %cst_36 {dimension_numbers = #tpu.dot_dimension_numbers<[1], [1], [0], [0], [0, 0, 1, 0], [], []>} : vector<8x8xf32>, vector<8x8xf32>, vector<8x8xf32> -> vector<8x8xf32>
    %96 = arith.mulf %95, %13 : vector<8x8xf32>
    %cst_37 = arith.constant dense<0xFF800000> : vector<8xf32>
    %97 = vector.multi_reduction <maximumf>, %96, %cst_37 [1] : vector<8x8xf32> to vector<8xf32>
    %98 = vector.shape_cast %97 : vector<8xf32> to vector<8x1xf32>
    %99 = vector.broadcast %98 : vector<8x1xf32> to vector<8x8xf32>
    %100 = arith.subf %96, %99 : vector<8x8xf32>
    %101 = math.exp %100 : vector<8x8xf32>
    %cst_38 = arith.constant dense<0.000000e+00> : vector<8xf32>
    %102 = vector.multi_reduction <add>, %101, %cst_38 [1] : vector<8x8xf32> to vector<8xf32>
    %103 = vector.shape_cast %102 : vector<8xf32> to vector<8x1xf32>
    %104 = tpu.reciprocal %103 {approx = true} : vector<8x1xf32> -> vector<8x1xf32>
    %105 = vector.broadcast %104 : vector<8x1xf32> to vector<8x8xf32>
    %106 = arith.mulf %101, %105 : vector<8x8xf32>
    %107 = arith.truncf %106 : vector<8x8xf32> to vector<8x8xbf16>
    %108 = arith.truncf %94 : vector<8x8xf32> to vector<8x8xbf16>
    %cst_39 = arith.constant dense<0.000000e+00> : vector<8x8xf32>
    %109 = tpu.matmul %107, %108, %cst_39 {dimension_numbers = #tpu.dot_dimension_numbers<[1], [0], [0], [1], [0, 0, 1, 1], [], []>} : vector<8x8xbf16>, vector<8x8xbf16>, vector<8x8xf32> -> vector<8x8xf32>
    %110 = arith.truncf %109 : vector<8x8xf32> to vector<8x8xbf16>
    %111 = vector.extract_strided_slice %21 {offsets = [24, 0], sizes = [8, 32], strides = [1, 1]} : vector<32x32xf32> to vector<8x32xf32>
    %112 = arith.truncf %111 : vector<8x32xf32> to vector<8x32xbf16>
    %cst_40 = arith.constant dense<0.000000e+00> : vector<8x32xf32>
    %113 = tpu.matmul %110, %112, %cst_40 {dimension_numbers = #tpu.dot_dimension_numbers<[1], [0], [0], [1], [0, 0, 1, 1], [], []>} : vector<8x8xbf16>, vector<8x32xbf16>, vector<8x32xf32> -> vector<8x32xf32>
    %114 = arith.addf %91, %113 : vector<8x32xf32>
    %115 = vector.shape_cast %114 : vector<8x32xf32> to vector<1x8x32xf32>
    %cst_41 = arith.constant dense<0.000000e+00> : vector<1xf32>
    %116 = vector.multi_reduction <add>, %115, %cst_41 [1, 2] : vector<1x8x32xf32> to vector<1xf32>
    %117 = vector.shape_cast %116 : vector<1xf32> to vector<1x1x1xf32>
    %118 = vector.extract %117[0, 0, 0] : f32 from vector<1x1x1xf32>
    %cst_42 = arith.constant 3.906250e-03 : f32
    %119 = arith.mulf %118, %cst_42 : f32
    %120 = arith.mulf %114, %114 : vector<8x32xf32>
    %121 = vector.shape_cast %120 : vector<8x32xf32> to vector<1x8x32xf32>
    %cst_43 = arith.constant dense<0.000000e+00> : vector<1xf32>
    %122 = vector.multi_reduction <add>, %121, %cst_43 [1, 2] : vector<1x8x32xf32> to vector<1xf32>
    %123 = vector.shape_cast %122 : vector<1xf32> to vector<1x1x1xf32>
    %124 = vector.extract %123[0, 0, 0] : f32 from vector<1x1x1xf32>
    %cst_44 = arith.constant 3.906250e-03 : f32
    %125 = arith.mulf %124, %cst_44 : f32
    %126 = arith.mulf %119, %119 : f32
    %127 = arith.subf %125, %126 : f32
    %128 = vector.broadcast %119 : f32 to vector<8x32xf32>
    %129 = arith.subf %114, %128 : vector<8x32xf32>
    %cst_45 = arith.constant 9.99999974E-6 : f32
    %130 = arith.addf %127, %cst_45 : f32
    %131 = math.rsqrt %130 : f32
    %132 = vector.broadcast %131 : f32 to vector<8x32xf32>
    %133 = arith.mulf %129, %132 : vector<8x32xf32>
    %134 = arith.mulf %133, %14 : vector<8x32xf32>
    %135 = arith.addf %134, %15 : vector<8x32xf32>
    %c1 = arith.constant 1 : index
    %c0_46 = arith.constant 0 : index
    %c0_47 = arith.constant 0 : index
    %136 = vector.load %arg2[%c1, %c0_46, %c0_47] : memref<2x32x32xf32, #tpu.memory_space<vmem>>, vector<1x32x32xf32>
    %137 = vector.shape_cast %136 : vector<1x32x32xf32> to vector<32x32xf32>
    %138 = vector.extract_strided_slice %0 {offsets = [8, 0], sizes = [8, 32], strides = [1, 1]} : vector<16x32xf32> to vector<8x32xf32>
    %139 = vector.extract_strided_slice %2 {offsets = [8, 0], sizes = [8, 8], strides = [1, 1]} : vector<16x128xf32> to vector<8x8xf32>
    %140 = vector.extract_strided_slice %2 {offsets = [8, 32], sizes = [8, 8], strides = [1, 1]} : vector<16x128xf32> to vector<8x8xf32>
    %141 = vector.extract_strided_slice %2 {offsets = [8, 64], sizes = [8, 8], strides = [1, 1]} : vector<16x128xf32> to vector<8x8xf32>
    %cst_48 = arith.constant dense<0.000000e+00> : vector<8x8xf32>
    %142 = tpu.matmul %139, %140, %cst_48 {dimension_numbers = #tpu.dot_dimension_numbers<[1], [1], [0], [0], [0, 0, 1, 0], [], []>} : vector<8x8xf32>, vector<8x8xf32>, vector<8x8xf32> -> vector<8x8xf32>
    %143 = arith.mulf %142, %13 : vector<8x8xf32>
    %cst_49 = arith.constant dense<0xFF800000> : vector<8xf32>
    %144 = vector.multi_reduction <maximumf>, %143, %cst_49 [1] : vector<8x8xf32> to vector<8xf32>
    %145 = vector.shape_cast %144 : vector<8xf32> to vector<8x1xf32>
    %146 = vector.broadcast %145 : vector<8x1xf32> to vector<8x8xf32>
    %147 = arith.subf %143, %146 : vector<8x8xf32>
    %148 = math.exp %147 : vector<8x8xf32>
    %cst_50 = arith.constant dense<0.000000e+00> : vector<8xf32>
    %149 = vector.multi_reduction <add>, %148, %cst_50 [1] : vector<8x8xf32> to vector<8xf32>
    %150 = vector.shape_cast %149 : vector<8xf32> to vector<8x1xf32>
    %151 = tpu.reciprocal %150 {approx = true} : vector<8x1xf32> -> vector<8x1xf32>
    %152 = vector.broadcast %151 : vector<8x1xf32> to vector<8x8xf32>
    %153 = arith.mulf %148, %152 : vector<8x8xf32>
    %154 = arith.truncf %153 : vector<8x8xf32> to vector<8x8xbf16>
    %155 = arith.truncf %141 : vector<8x8xf32> to vector<8x8xbf16>
    %cst_51 = arith.constant dense<0.000000e+00> : vector<8x8xf32>
    %156 = tpu.matmul %154, %155, %cst_51 {dimension_numbers = #tpu.dot_dimension_numbers<[1], [0], [0], [1], [0, 0, 1, 1], [], []>} : vector<8x8xbf16>, vector<8x8xbf16>, vector<8x8xf32> -> vector<8x8xf32>
    %157 = arith.truncf %156 : vector<8x8xf32> to vector<8x8xbf16>
    %158 = vector.extract_strided_slice %137 {offsets = [0, 0], sizes = [8, 32], strides = [1, 1]} : vector<32x32xf32> to vector<8x32xf32>
    %159 = arith.truncf %158 : vector<8x32xf32> to vector<8x32xbf16>
    %cst_52 = arith.constant dense<0.000000e+00> : vector<8x32xf32>
    %160 = tpu.matmul %157, %159, %cst_52 {dimension_numbers = #tpu.dot_dimension_numbers<[1], [0], [0], [1], [0, 0, 1, 1], [], []>} : vector<8x8xbf16>, vector<8x32xbf16>, vector<8x32xf32> -> vector<8x32xf32>
    %161 = arith.addf %138, %160 : vector<8x32xf32>
    %162 = vector.extract_strided_slice %2 {offsets = [8, 8], sizes = [8, 8], strides = [1, 1]} : vector<16x128xf32> to vector<8x8xf32>
    %163 = vector.extract_strided_slice %2 {offsets = [8, 40], sizes = [8, 8], strides = [1, 1]} : vector<16x128xf32> to vector<8x8xf32>
    %164 = vector.extract_strided_slice %2 {offsets = [8, 72], sizes = [8, 8], strides = [1, 1]} : vector<16x128xf32> to vector<8x8xf32>
    %cst_53 = arith.constant dense<0.000000e+00> : vector<8x8xf32>
    %165 = tpu.matmul %162, %163, %cst_53 {dimension_numbers = #tpu.dot_dimension_numbers<[1], [1], [0], [0], [0, 0, 1, 0], [], []>} : vector<8x8xf32>, vector<8x8xf32>, vector<8x8xf32> -> vector<8x8xf32>
    %166 = arith.mulf %165, %13 : vector<8x8xf32>
    %cst_54 = arith.constant dense<0xFF800000> : vector<8xf32>
    %167 = vector.multi_reduction <maximumf>, %166, %cst_54 [1] : vector<8x8xf32> to vector<8xf32>
    %168 = vector.shape_cast %167 : vector<8xf32> to vector<8x1xf32>
    %169 = vector.broadcast %168 : vector<8x1xf32> to vector<8x8xf32>
    %170 = arith.subf %166, %169 : vector<8x8xf32>
    %171 = math.exp %170 : vector<8x8xf32>
    %cst_55 = arith.constant dense<0.000000e+00> : vector<8xf32>
    %172 = vector.multi_reduction <add>, %171, %cst_55 [1] : vector<8x8xf32> to vector<8xf32>
    %173 = vector.shape_cast %172 : vector<8xf32> to vector<8x1xf32>
    %174 = tpu.reciprocal %173 {approx = true} : vector<8x1xf32> -> vector<8x1xf32>
    %175 = vector.broadcast %174 : vector<8x1xf32> to vector<8x8xf32>
    %176 = arith.mulf %171, %175 : vector<8x8xf32>
    %177 = arith.truncf %176 : vector<8x8xf32> to vector<8x8xbf16>
    %178 = arith.truncf %164 : vector<8x8xf32> to vector<8x8xbf16>
    %cst_56 = arith.constant dense<0.000000e+00> : vector<8x8xf32>
    %179 = tpu.matmul %177, %178, %cst_56 {dimension_numbers = #tpu.dot_dimension_numbers<[1], [0], [0], [1], [0, 0, 1, 1], [], []>} : vector<8x8xbf16>, vector<8x8xbf16>, vector<8x8xf32> -> vector<8x8xf32>
    %180 = arith.truncf %179 : vector<8x8xf32> to vector<8x8xbf16>
    %181 = vector.extract_strided_slice %137 {offsets = [8, 0], sizes = [8, 32], strides = [1, 1]} : vector<32x32xf32> to vector<8x32xf32>
    %182 = arith.truncf %181 : vector<8x32xf32> to vector<8x32xbf16>
    %cst_57 = arith.constant dense<0.000000e+00> : vector<8x32xf32>
    %183 = tpu.matmul %180, %182, %cst_57 {dimension_numbers = #tpu.dot_dimension_numbers<[1], [0], [0], [1], [0, 0, 1, 1], [], []>} : vector<8x8xbf16>, vector<8x32xbf16>, vector<8x32xf32> -> vector<8x32xf32>
    %184 = arith.addf %161, %183 : vector<8x32xf32>
    %185 = vector.extract_strided_slice %2 {offsets = [8, 16], sizes = [8, 8], strides = [1, 1]} : vector<16x128xf32> to vector<8x8xf32>
    %186 = vector.extract_strided_slice %2 {offsets = [8, 48], sizes = [8, 8], strides = [1, 1]} : vector<16x128xf32> to vector<8x8xf32>
    %187 = vector.extract_strided_slice %2 {offsets = [8, 80], sizes = [8, 8], strides = [1, 1]} : vector<16x128xf32> to vector<8x8xf32>
    %cst_58 = arith.constant dense<0.000000e+00> : vector<8x8xf32>
    %188 = tpu.matmul %185, %186, %cst_58 {dimension_numbers = #tpu.dot_dimension_numbers<[1], [1], [0], [0], [0, 0, 1, 0], [], []>} : vector<8x8xf32>, vector<8x8xf32>, vector<8x8xf32> -> vector<8x8xf32>
    %189 = arith.mulf %188, %13 : vector<8x8xf32>
    %cst_59 = arith.constant dense<0xFF800000> : vector<8xf32>
    %190 = vector.multi_reduction <maximumf>, %189, %cst_59 [1] : vector<8x8xf32> to vector<8xf32>
    %191 = vector.shape_cast %190 : vector<8xf32> to vector<8x1xf32>
    %192 = vector.broadcast %191 : vector<8x1xf32> to vector<8x8xf32>
    %193 = arith.subf %189, %192 : vector<8x8xf32>
    %194 = math.exp %193 : vector<8x8xf32>
    %cst_60 = arith.constant dense<0.000000e+00> : vector<8xf32>
    %195 = vector.multi_reduction <add>, %194, %cst_60 [1] : vector<8x8xf32> to vector<8xf32>
    %196 = vector.shape_cast %195 : vector<8xf32> to vector<8x1xf32>
    %197 = tpu.reciprocal %196 {approx = true} : vector<8x1xf32> -> vector<8x1xf32>
    %198 = vector.broadcast %197 : vector<8x1xf32> to vector<8x8xf32>
    %199 = arith.mulf %194, %198 : vector<8x8xf32>
    %200 = arith.truncf %199 : vector<8x8xf32> to vector<8x8xbf16>
    %201 = arith.truncf %187 : vector<8x8xf32> to vector<8x8xbf16>
    %cst_61 = arith.constant dense<0.000000e+00> : vector<8x8xf32>
    %202 = tpu.matmul %200, %201, %cst_61 {dimension_numbers = #tpu.dot_dimension_numbers<[1], [0], [0], [1], [0, 0, 1, 1], [], []>} : vector<8x8xbf16>, vector<8x8xbf16>, vector<8x8xf32> -> vector<8x8xf32>
    %203 = arith.truncf %202 : vector<8x8xf32> to vector<8x8xbf16>
    %204 = vector.extract_strided_slice %137 {offsets = [16, 0], sizes = [8, 32], strides = [1, 1]} : vector<32x32xf32> to vector<8x32xf32>
    %205 = arith.truncf %204 : vector<8x32xf32> to vector<8x32xbf16>
    %cst_62 = arith.constant dense<0.000000e+00> : vector<8x32xf32>
    %206 = tpu.matmul %203, %205, %cst_62 {dimension_numbers = #tpu.dot_dimension_numbers<[1], [0], [0], [1], [0, 0, 1, 1], [], []>} : vector<8x8xbf16>, vector<8x32xbf16>, vector<8x32xf32> -> vector<8x32xf32>
    %207 = arith.addf %184, %206 : vector<8x32xf32>
    %208 = vector.extract_strided_slice %2 {offsets = [8, 24], sizes = [8, 8], strides = [1, 1]} : vector<16x128xf32> to vector<8x8xf32>
    %209 = vector.extract_strided_slice %2 {offsets = [8, 56], sizes = [8, 8], strides = [1, 1]} : vector<16x128xf32> to vector<8x8xf32>
    %210 = vector.extract_strided_slice %2 {offsets = [8, 88], sizes = [8, 8], strides = [1, 1]} : vector<16x128xf32> to vector<8x8xf32>
    %cst_63 = arith.constant dense<0.000000e+00> : vector<8x8xf32>
    %211 = tpu.matmul %208, %209, %cst_63 {dimension_numbers = #tpu.dot_dimension_numbers<[1], [1], [0], [0], [0, 0, 1, 0], [], []>} : vector<8x8xf32>, vector<8x8xf32>, vector<8x8xf32> -> vector<8x8xf32>
    %212 = arith.mulf %211, %13 : vector<8x8xf32>
    %cst_64 = arith.constant dense<0xFF800000> : vector<8xf32>
    %213 = vector.multi_reduction <maximumf>, %212, %cst_64 [1] : vector<8x8xf32> to vector<8xf32>
    %214 = vector.shape_cast %213 : vector<8xf32> to vector<8x1xf32>
    %215 = vector.broadcast %214 : vector<8x1xf32> to vector<8x8xf32>
    %216 = arith.subf %212, %215 : vector<8x8xf32>
    %217 = math.exp %216 : vector<8x8xf32>
    %cst_65 = arith.constant dense<0.000000e+00> : vector<8xf32>
    %218 = vector.multi_reduction <add>, %217, %cst_65 [1] : vector<8x8xf32> to vector<8xf32>
    %219 = vector.shape_cast %218 : vector<8xf32> to vector<8x1xf32>
    %220 = tpu.reciprocal %219 {approx = true} : vector<8x1xf32> -> vector<8x1xf32>
    %221 = vector.broadcast %220 : vector<8x1xf32> to vector<8x8xf32>
    %222 = arith.mulf %217, %221 : vector<8x8xf32>
    %223 = arith.truncf %222 : vector<8x8xf32> to vector<8x8xbf16>
    %224 = arith.truncf %210 : vector<8x8xf32> to vector<8x8xbf16>
    %cst_66 = arith.constant dense<0.000000e+00> : vector<8x8xf32>
    %225 = tpu.matmul %223, %224, %cst_66 {dimension_numbers = #tpu.dot_dimension_numbers<[1], [0], [0], [1], [0, 0, 1, 1], [], []>} : vector<8x8xbf16>, vector<8x8xbf16>, vector<8x8xf32> -> vector<8x8xf32>
    %226 = arith.truncf %225 : vector<8x8xf32> to vector<8x8xbf16>
    %227 = vector.extract_strided_slice %137 {offsets = [24, 0], sizes = [8, 32], strides = [1, 1]} : vector<32x32xf32> to vector<8x32xf32>
    %228 = arith.truncf %227 : vector<8x32xf32> to vector<8x32xbf16>
    %cst_67 = arith.constant dense<0.000000e+00> : vector<8x32xf32>
    %229 = tpu.matmul %226, %228, %cst_67 {dimension_numbers = #tpu.dot_dimension_numbers<[1], [0], [0], [1], [0, 0, 1, 1], [], []>} : vector<8x8xbf16>, vector<8x32xbf16>, vector<8x32xf32> -> vector<8x32xf32>
    %230 = arith.addf %207, %229 : vector<8x32xf32>
    %231 = vector.shape_cast %230 : vector<8x32xf32> to vector<1x8x32xf32>
    %cst_68 = arith.constant dense<0.000000e+00> : vector<1xf32>
    %232 = vector.multi_reduction <add>, %231, %cst_68 [1, 2] : vector<1x8x32xf32> to vector<1xf32>
    %233 = vector.shape_cast %232 : vector<1xf32> to vector<1x1x1xf32>
    %234 = vector.extract %233[0, 0, 0] : f32 from vector<1x1x1xf32>
    %cst_69 = arith.constant 3.906250e-03 : f32
    %235 = arith.mulf %234, %cst_69 : f32
    %236 = arith.mulf %230, %230 : vector<8x32xf32>
    %237 = vector.shape_cast %236 : vector<8x32xf32> to vector<1x8x32xf32>
    %cst_70 = arith.constant dense<0.000000e+00> : vector<1xf32>
    %238 = vector.multi_reduction <add>, %237, %cst_70 [1, 2] : vector<1x8x32xf32> to vector<1xf32>
    %239 = vector.shape_cast %238 : vector<1xf32> to vector<1x1x1xf32>
    %240 = vector.extract %239[0, 0, 0] : f32 from vector<1x1x1xf32>
    %cst_71 = arith.constant 3.906250e-03 : f32
    %241 = arith.mulf %240, %cst_71 : f32
    %242 = arith.mulf %235, %235 : f32
    %243 = arith.subf %241, %242 : f32
    %244 = vector.broadcast %235 : f32 to vector<8x32xf32>
    %245 = arith.subf %230, %244 : vector<8x32xf32>
    %cst_72 = arith.constant 9.99999974E-6 : f32
    %246 = arith.addf %243, %cst_72 : f32
    %247 = math.rsqrt %246 : f32
    %248 = vector.broadcast %247 : f32 to vector<8x32xf32>
    %249 = arith.mulf %245, %248 : vector<8x32xf32>
    %250 = arith.mulf %249, %14 : vector<8x32xf32>
    %251 = arith.addf %250, %15 : vector<8x32xf32>
    %252 = tpu.concatenate %135, %251 in 0 : vector<8x32xf32>, vector<8x32xf32> -> vector<16x32xf32>
    %253 = arith.truncf %252 : vector<16x32xf32> to vector<16x32xbf16>
    %cst_73 = arith.constant dense<0.000000e+00> : vector<16x32xf32>
    %254 = tpu.matmul %253, %18, %cst_73 {dimension_numbers = #tpu.dot_dimension_numbers<[1], [0], [0], [1], [0, 0, 1, 1], [], []>} : vector<16x32xbf16>, vector<32x32xbf16>, vector<16x32xf32> -> vector<16x32xf32>
    %255 = vector.broadcast %19 : vector<1x32xf32> to vector<16x32xf32>
    %256 = arith.addf %254, %255 : vector<16x32xf32>
    %cst_74 = arith.constant 0.000000e+00 : f32
    %257 = vector.broadcast %cst_74 : f32 to vector<16x32xf32>
    %258 = arith.maximumf %256, %257 : vector<16x32xf32>
    %259 = arith.addf %252, %258 : vector<16x32xf32>
    %260 = vector.extract_strided_slice %259 {offsets = [0, 0], sizes = [8, 32], strides = [1, 1]} : vector<16x32xf32> to vector<8x32xf32>
    %261 = vector.shape_cast %260 : vector<8x32xf32> to vector<1x8x32xf32>
    %cst_75 = arith.constant dense<0.000000e+00> : vector<1xf32>
    %262 = vector.multi_reduction <add>, %261, %cst_75 [1, 2] : vector<1x8x32xf32> to vector<1xf32>
    %263 = vector.shape_cast %262 : vector<1xf32> to vector<1x1x1xf32>
    %264 = vector.extract %263[0, 0, 0] : f32 from vector<1x1x1xf32>
    %cst_76 = arith.constant 3.906250e-03 : f32
    %265 = arith.mulf %264, %cst_76 : f32
    %266 = arith.mulf %260, %260 : vector<8x32xf32>
    %267 = vector.shape_cast %266 : vector<8x32xf32> to vector<1x8x32xf32>
    %cst_77 = arith.constant dense<0.000000e+00> : vector<1xf32>
    %268 = vector.multi_reduction <add>, %267, %cst_77 [1, 2] : vector<1x8x32xf32> to vector<1xf32>
    %269 = vector.shape_cast %268 : vector<1xf32> to vector<1x1x1xf32>
    %270 = vector.extract %269[0, 0, 0] : f32 from vector<1x1x1xf32>
    %cst_78 = arith.constant 3.906250e-03 : f32
    %271 = arith.mulf %270, %cst_78 : f32
    %272 = arith.mulf %265, %265 : f32
    %273 = arith.subf %271, %272 : f32
    %274 = vector.broadcast %265 : f32 to vector<8x32xf32>
    %275 = arith.subf %260, %274 : vector<8x32xf32>
    %cst_79 = arith.constant 9.99999974E-6 : f32
    %276 = arith.addf %273, %cst_79 : f32
    %277 = math.rsqrt %276 : f32
    %278 = vector.broadcast %277 : f32 to vector<8x32xf32>
    %279 = arith.mulf %275, %278 : vector<8x32xf32>
    %280 = arith.mulf %279, %16 : vector<8x32xf32>
    %281 = arith.addf %280, %17 : vector<8x32xf32>
    %282 = vector.extract_strided_slice %259 {offsets = [8, 0], sizes = [8, 32], strides = [1, 1]} : vector<16x32xf32> to vector<8x32xf32>
    %283 = vector.shape_cast %282 : vector<8x32xf32> to vector<1x8x32xf32>
    %cst_80 = arith.constant dense<0.000000e+00> : vector<1xf32>
    %284 = vector.multi_reduction <add>, %283, %cst_80 [1, 2] : vector<1x8x32xf32> to vector<1xf32>
    %285 = vector.shape_cast %284 : vector<1xf32> to vector<1x1x1xf32>
    %286 = vector.extract %285[0, 0, 0] : f32 from vector<1x1x1xf32>
    %cst_81 = arith.constant 3.906250e-03 : f32
    %287 = arith.mulf %286, %cst_81 : f32
    %288 = arith.mulf %282, %282 : vector<8x32xf32>
    %289 = vector.shape_cast %288 : vector<8x32xf32> to vector<1x8x32xf32>
    %cst_82 = arith.constant dense<0.000000e+00> : vector<1xf32>
    %290 = vector.multi_reduction <add>, %289, %cst_82 [1, 2] : vector<1x8x32xf32> to vector<1xf32>
    %291 = vector.shape_cast %290 : vector<1xf32> to vector<1x1x1xf32>
    %292 = vector.extract %291[0, 0, 0] : f32 from vector<1x1x1xf32>
    %cst_83 = arith.constant 3.906250e-03 : f32
    %293 = arith.mulf %292, %cst_83 : f32
    %294 = arith.mulf %287, %287 : f32
    %295 = arith.subf %293, %294 : f32
    %296 = vector.broadcast %287 : f32 to vector<8x32xf32>
    %297 = arith.subf %282, %296 : vector<8x32xf32>
    %cst_84 = arith.constant 9.99999974E-6 : f32
    %298 = arith.addf %295, %cst_84 : f32
    %299 = math.rsqrt %298 : f32
    %300 = vector.broadcast %299 : f32 to vector<8x32xf32>
    %301 = arith.mulf %297, %300 : vector<8x32xf32>
    %302 = arith.mulf %301, %16 : vector<8x32xf32>
    %303 = arith.addf %302, %17 : vector<8x32xf32>
    %304 = tpu.concatenate %281, %303 in 0 : vector<8x32xf32>, vector<8x32xf32> -> vector<16x32xf32>
    %c0_85 = arith.constant 0 : index
    %c0_86 = arith.constant 0 : index
    %305 = vector.load %arg9[%c0_85, %c0_86] : memref<16x32xf32, #tpu.memory_space<vmem>>, vector<16x32xf32>
    tpu.vector_store %arg9[%c0_85, %c0_86], %304 {strides = array<i32>} : memref<16x32xf32, #tpu.memory_space<vmem>>, vector<16x32xf32>,
    return
  }
}

</mosaic_0001>

<bundles_post_ra>
// kernel: tpu_custom_call.1
= control target key start
LH: loop header
LB: loop body
LE: loop exit
PB: predicated region body
PF: predicated region fallthrough
CT: control target
= control target key end

     0   :  { %14 = vsyncpa [#allocation3], 0  ;;  %s2915_s0 = inlined_call_operand.hbm [shape: f32[16,32], index: 0, kind: input, shape index: {}]   ;;  %s2916_s1 = inlined_call_operand.hbm [shape: f32[32,128], index: 1, kind: input, shape index: {}]   ;;  %s2917_s2 = inlined_call_operand.hbm [shape: f32[2,32,32], index: 2, kind: input, shape index: {}]   ;;  %s2918_s3 = inlined_call_operand.hbm [shape: bf16[32,32], index: 3, kind: input, shape index: {}]   ;;  %s2919_s4 = inlined_call_operand.vmem [shape: f32[1,32], index: 4, kind: input, shape index: {}]   ;;  %s2920_s5 = inlined_call_operand.vmem [shape: f32[8,32], index: 5, kind: input, shape index: {}]   ;;  %s2921_s6 = inlined_call_operand.vmem [shape: f32[8,32], index: 6, kind: input, shape index: {}]   ;;  %s2922_s7 = inlined_call_operand.vmem [shape: f32[8,32], index: 7, kind: input, shape index: {}]   ;;  %s2923_s8 = inlined_call_operand.hbm [shape: f32[8,32], index: 8, kind: input, shape index: {}]   ;;  %s2924_s9 = inlined_call_operand.hbm [shape: f32[16,32], index: 9, kind: output, shape index: {}]  }
   0x1   :  { %15 = vsyncpa [#allocation6], 0 }
   0x2   :  { %16 = vsyncpa [#allocation9], 0 }
   0x3   :  { %17 = vsyncpa [#allocation4], 0  ;;  %s2465_s30 = smov [#allocation5]   ;;  %s2466_s11 = smov [#allocation8]  }
   0x4   :  { %s35_s10 = sshll.u32 %s2465_s30, 4  ;;  %s59_s12 = sshll.u32 %s2466_s11, 4  ;;  %s36_s10 = int_to_ptr.vmem [resolvable:$true] %s35_s10  ;;  %s2537_s12 = int_to_ptr.vmem [resolvable:$true] %s59_s12 }
   0x5   :  { %s2325_s15 = scalar_lea.hbm %s2916_s1, 512 }
   0x6   :  { %p2326_p0 = scmp.ne.s32.totalorder %s2916_s1, %s2325_s15  ;;  %p2329_p1 = scmp.lt.u32.totalorder %s2325_s15, %s2916_s1 }
   0x8   :  { %p2331_p2 = pnand %p2329_p1, %p2326_p0 }
   0xa   :  { %2334 = shalt.err (!%p2331_p2)
}
   0xb   :  { %s2335_s20 = scalar_lea.vmem %s36_s10, 512  ;;  %p2340_p4 = scmp.lt.s32.totalorder %s36_s10, %s36_s10 }
   0xc   :  { %p2336_p3 = scmp.ne.s32.totalorder %s36_s10, %s2335_s20  ;;  %p2341_p5 = scmp.lt.s32.totalorder %s2335_s20, %s2335_s20 }
   0xe   :  { %p2342_p6 = por %p2341_p5, %p2340_p4 }
  0x10   :  { %p2343_p7 = pnand %p2342_p6, %p2336_p3 }
  0x12   :  { %2346 = shalt.err (!%p2343_p7)
}
  0x13   :  { %s2467_s21 = smov 128   ;;  %s2468_s22 = smov 8  }
  0x14   :  { %41 = dma.hbm_to_vmem [thread:$0]  %s2916_s1, 512, %s36_s10, [#allocation6], %s2467_s21, %s2467_s21, %s2468_s22  }
  0x15   :  { %s2347_s27 = scalar_lea.hbm %s2918_s3, 256 }
  0x16   :  { %p2348_p8 = scmp.ne.s32.totalorder %s2918_s3, %s2347_s27  ;;  %p2351_p9 = scmp.lt.u32.totalorder %s2347_s27, %s2918_s3 }
  0x18   :  { %p2353_p10 = pnand %p2351_p9, %p2348_p8 }
  0x1a   :  { %2356 = shalt.err (!%p2353_p10)
}
  0x1b   :  { %s2357_s13 = scalar_lea.vmem %s2537_s12, 256  ;;  %p2362_p12 = scmp.lt.s32.totalorder %s2537_s12, %s2537_s12 }
  0x1c   :  { %p2358_p11 = scmp.ne.s32.totalorder %s2537_s12, %s2357_s13  ;;  %p2363_p13 = scmp.lt.s32.totalorder %s2357_s13, %s2357_s13 }
  0x1e   :  { %p2364_p0 = por %p2363_p13, %p2362_p12 }
  0x20   :  { %p2365_p1 = pnand %p2364_p0, %p2358_p11 }
  0x22   :  { %2368 = shalt.err (!%p2365_p1)
}
  0x23   :  { %s2469_s1 = smov 64   ;;  %s2470_s10 = smov 4  }
  0x24   :  { %65 = dma.hbm_to_vmem [thread:$0]  %s2918_s3, 256, %s2537_s12, [#allocation9], %s2469_s1, %s2469_s1, %s2470_s10  }
  0x25   :  { %s2471_s16 = smov [#allocation2]   ;;  %s2472_s18 = smov [#allocation7]  }
  0x26   :  { %s23_s17 = sshll.u32 %s2471_s16, 4  ;;  %s47_s19 = sshll.u32 %s2472_s18, 4  ;;  %s24_s17 = int_to_ptr.vmem [resolvable:$true] %s23_s17  ;;  %s2573_s19 = int_to_ptr.vmem [resolvable:$true] %s47_s19 }
  0x27   :  { %s2369_s24 = scalar_lea.hbm %s2915_s0, 256 }
  0x28   :  { %p2370_p2 = scmp.ne.s32.totalorder %s2915_s0, %s2369_s24  ;;  %p2373_p3 = scmp.lt.u32.totalorder %s2369_s24, %s2915_s0 }
  0x2a   :  { %p2375_p4 = pnand %p2373_p3, %p2370_p2 }
  0x2c   :  { %2378 = shalt.err (!%p2375_p4)
}
  0x2d   :  { %s2379_s3 = scalar_lea.vmem %s24_s17, 256  ;;  %p2384_p6 = scmp.lt.s32.totalorder %s24_s17, %s24_s17 }
  0x2e   :  { %p2380_p5 = scmp.ne.s32.totalorder %s24_s17, %s2379_s3  ;;  %p2385_p7 = scmp.lt.s32.totalorder %s2379_s3, %s2379_s3 }
  0x30   :  { %p2386_p8 = por %p2385_p7, %p2384_p6 }
  0x32   :  { %p2387_p9 = pnand %p2386_p8, %p2380_p5 }
  0x34   :  { %2390 = shalt.err (!%p2387_p9)
}
  0x35   :  { %29 = dma.hbm_to_vmem [thread:$0]  %s2915_s0, 256, %s24_s17, [#allocation3], %s2467_s21, %s2467_s21, %s2468_s22  }
  0x36   :  { %s2391_s13 = scalar_lea.hbm %s2917_s2, 1024 }
  0x37   :  { %p2392_p10 = scmp.ne.s32.totalorder %s2917_s2, %s2391_s13  ;;  %p2395_p11 = scmp.lt.u32.totalorder %s2391_s13, %s2917_s2 }
  0x39   :  { %p2397_p12 = pnand %p2395_p11, %p2392_p10 }
  0x3b   :  { %2400 = shalt.err (!%p2397_p12)
}
  0x3c   :  { %s2401_s18 = scalar_lea.vmem %s2573_s19, 1024  ;;  %p2406_p0 = scmp.lt.s32.totalorder %s2573_s19, %s2573_s19 }
  0x3d   :  { %p2402_p13 = scmp.ne.s32.totalorder %s2573_s19, %s2401_s18  ;;  %p2407_p1 = scmp.lt.s32.totalorder %s2401_s18, %s2401_s18 }
  0x3f   :  { %p2408_p2 = por %p2407_p1, %p2406_p0 }
  0x41   :  { %p2409_p3 = pnand %p2408_p2, %p2402_p13 }
  0x43   :  { %2412 = shalt.err (!%p2409_p3)
}
  0x44   :  { %53 = dma.hbm_to_vmem [thread:$0]  %s2917_s2, 1024, %s2573_s19, [#allocation6], %s2467_s21, %s2467_s21, %s2468_s22  }
  0x45   :  { %s2473_s20 = smov [#allocation10]   ;;  %s2413_s26 = scalar_lea.hbm %s2923_s8, 128 }
  0x46   :  { %s80_s23 = sshll.u32 %s2473_s20, 4  ;;  %p2414_p4 = scmp.ne.s32.totalorder %s2923_s8, %s2413_s26  ;;  %s81_s23 = int_to_ptr.vmem [resolvable:$true] %s80_s23 }
  0x47   :  { %p2417_p5 = scmp.lt.u32.totalorder %s2413_s26, %s2923_s8 }
  0x49   :  { %p2419_p6 = pnand %p2417_p5, %p2414_p4 }
  0x4b   :  { %2422 = shalt.err (!%p2419_p6)
}
  0x4c   :  { %s2423_s29 = scalar_lea.vmem %s81_s23, 128  ;;  %p2428_p8 = scmp.lt.s32.totalorder %s81_s23, %s81_s23 }
  0x4d   :  { %p2424_p7 = scmp.ne.s32.totalorder %s81_s23, %s2423_s29  ;;  %p2429_p9 = scmp.lt.s32.totalorder %s2423_s29, %s2423_s29 }
  0x4f   :  { %p2430_p10 = por %p2429_p9, %p2428_p8 }
  0x51   :  { %p2431_p11 = pnand %p2430_p10, %p2424_p7 }
  0x53   :  { %2434 = shalt.err (!%p2431_p11)
}
  0x54   :  { %83 = dma.hbm_to_vmem [thread:$0]  %s2923_s8, 128, %s81_s23, [#allocation9]  }
  0x55   :  { %2457 = dma.done.wait [#allocation3], 256  }
  0x56   :  { %2458 = vsyncadd [#allocation3], 4294967040 }
  0x57   :  { %2459 = dma.done.wait [#allocation6], 1536  }
  0x58   :  { %2460 = vsyncadd [#allocation6], 4294965760 }
  0x59   :  { %2461 = dma.done.wait [#allocation9], 384  }
  0x5a   :  { %2462 = vsyncadd [#allocation9], 4294966912  ;;  %vm106_vm0 = vcmask 261120   ;;  %v102_v0 = vld [vmem:[#allocation5] sm:$0xff]  ;;  %v103_v1 = vld [vmem:[#allocation5 + $0x8] sm:$0xff]  ;;  %v2474_v8 = vmov 0.0   ;;  %v188_v15 = vlaneseq }
  0x5b   :  { %v104_v2 = vld [vmem:[#allocation5 + $0x10] sm:$0xff]  ;;  %v2203_v3 = vpack.c.bf16 %v103_v1, %v102_v0  ;;  %v105_v4 = vld [vmem:[#allocation5 + $0x18] sm:$0xff]  ;;  %2059 = vmatprep.subr.mxu1 %v2474_v8  ;;  %vm2475_vm1 = vmmov 0   ;;  %s2476_s8 = smov 96   ;;  %s2477_s30 = smov 88   ;;  %vm214_vm2 = vcmask 64512  }
  0x5c   :  { %v2622_v5 = vld [vmem:[#allocation2] sm:$0xff]  ;;  %v2207_v6 = vpack.c.bf16 %v105_v4, %v104_v2  ;;  %v2626_v7 = vld [vmem:[#allocation2 + $0x8] sm:$0xff]  ;;  %2061 = vmatprep.mubr.msk.f32.mxu1 %vm2475_vm1, %v2474_v8  ;;  %vm309_vm3 = vcmask 1043456   ;;  %v189_v16 = vshrl.u32 %v188_v15, 7  ;;  %v191_v17 = vand.u32 127, %v188_v15  ;;  %s2478_s11 = smov 120  }
  0x5d   :  { %2056 = vmatprep.mubr.msk.f32.mxu0 %vm106_vm0, %v2622_v5  ;;  %2204 = vmatprep.subr.bf16.mxu0 %v2203_v3  ;;  %s2479_s13 = smov 80   ;;  %s2480_s10 = smov 112   ;;  %v207_v39 = vld [vmem:[#allocation7] sm:$0xff] }
  0x5e   :  { %2206 = vmatpush3.bf16.msra.mxu0 %v2203_v3  ;;  %vm192_vm4 = vcmp.gt.s32.totalorder %v191_v17, %v189_v16  ;;  %v354_v40 = vpack.c.bf16 %v207_v39, %v207_v39  ;;  %s2481_s14 = smov 48   ;;  %s2482_s15 = smov 72  }
  0x5f   :  { %2208 = vmatprep.subr.bf16.mxu0 %v2207_v6  ;;  %v1954_v18 = vsel %vm192_vm4, 1.0, %v2474_v8  ;;  %s2483_s16 = smov 104   ;;  %s2484_s18 = smov 40  }
  0x60   :  { %v195_v19 = vmul.f32 -1e+09, %v1954_v18  ;;  %v359_v41 = vsel %vm309_vm3, %v354_v40, 0 }
  0x62   :  { %2210 = vmatpush3.bf16.msra.mxu0 %v2207_v6  ;;  %v196_v20 = vadd.f32 1.0, %v195_v19 }
  0x63   :  { %2070 = vmatprep.subr.bf16.mxu0 %v2474_v8 }
  0x64   :  { %v2659_v21 = vmul.f32 0.35355338, %v196_v20 }
  0x65   :  { %2057 = vmatmul.mubr.msk.f32.vlgmr.msra.gmra.mrb[0].mxu0 %vm106_vm0, %v2626_v7 }
  0x66   :  { %2072 = vmatprep.mubr.msk.bf16.mxu0 %vm2475_vm1, %v2474_v8  ;;  %2071 = vmatpush3.bf16.msra.mxu0 %v359_v41 }
  0x67   :  { %2081 = vmatprep.subr.bf16.mxu0 %v2474_v8 }
 0x138   :  { %v2636_v9 = vpop.f32.mrb[0].mxu0 }
 0x139   :  { %v2638_v10 = vpop.f32.mrb[1].mxu0  ;;  %v2719_v17 = vpack.c.bf16 %v2636_v9, %v2636_v9 }
 0x13a   :  { %212 = vrot.lane.b32.xlu0 %v2638_v10, %s2476_s8  ;;  %v2644_v11 = vpack.c.bf16 %v2638_v10, %v2638_v10 }
 0x13c   :  { %304 = vrot.lane.b32.xlu1 %v2644_v11, %s2469_s1 }
 0x140   :  { %404 = vrot.lane.b32.xlu1 %v2638_v10, %s2477_s30 }
 0x1ac   :  { %v213_v12 = vpop.permute.xlu0 %212 }
 0x1ad   :  { %2060 = vmatpush3.xpose.msk.msra.mxu1 %vm214_vm2, %v213_v12 }
 0x1ae   :  { %v305_v13 = vpop.permute.xlu1 %304  ;;  %2064 = vmatprep.subr.bf16.mxu1 %v2474_v8 }
 0x1af   :  { %v311_v14 = vsel %vm309_vm3, %v305_v13, 0 }
 0x1b0   :  { %2062 = vmatmul.mubr.msk.f32.vlgmr.msra.gmra.mrb[0].mxu1 %vm214_vm2, %v2638_v10 }
 0x1b1   :  { %2065 = vmatpush3.bf16.msra.mxu1 %v311_v14  ;;  %2066 = vmatprep.mubr.msk.bf16.mxu1 %vm2475_vm1, %v2474_v8 }
 0x1b2   :  { %2076 = vmatprep.subr.mxu1 %v2474_v8  ;;  %v405_v31 = vpop.permute.xlu1 %404 }
 0x283   :  { %v285_v22 = vpop.f32.mrb[0].mxu1 }
 0x284   :  { %v289_v23 = vmul.f32 %v285_v22, %v2659_v21  ;;  %v2063_v24 = vpop.f32.mrb[1].mxu1 }
 0x286   :  { %v290_v25 = vsel %vm214_vm2, %v289_v23, -inf }
 0x287   :  { %291 = vmax.xlane.f32.xlu0 %v290_v25 }
 0x314   :  { %v292_v26 = vpop.xlane.xlu0 %291 }
 0x315   :  { %v293_v27 = vsub.f32 %v289_v23, %v292_v26 }
 0x317   :  { %v294_v28 = vmul.f32 1.442695, %v293_v27 }
 0x319   :  { %2285 = vpow2.f32 %v294_v28 }
 0x323   :  { %v2286_v29 = vpop.eup %2285 }
 0x324   :  { %v296_v30 = vsel %vm214_vm2, %v2286_v29, 0.0 }
 0x325   :  { %297 = vadd.xlane.f32.xlu1 %v296_v30 }
 0x336   :  { %402 = vrot.lane.b32.xlu1 %v2638_v10, %s2478_s11 }
 0x33a   :  { %592 = vrot.lane.b32.xlu1 %v2638_v10, %s2479_s13 }
 0x33e   :  { %590 = vrot.lane.b32.xlu1 %v2638_v10, %s2480_s10 }
 0x3b2   :  { %v298_v32 = vpop.xlane.xlu1 %297 }
 0x3b3   :  { %2287 = vrcp.f32 %v298_v32 }
 0x3b6   :  { %v403_v36 = vpop.permute.xlu1 %402 }
 0x3ba   :  { %v593_v37 = vpop.permute.xlu1 %592 }
 0x3bd   :  { %v2288_v33 = vpop.eup %2287 }
 0x3be   :  { %v300_v34 = vmul.f32 %v2288_v33, %v2286_v29  ;;  %v591_v38 = vpop.permute.xlu1 %590 }
 0x3c0   :  { %v301_v35 = vpack.c.bf16 %v300_v34, %v300_v34 }
 0x3c2   :  { %2067 = vmatmul.mubr.msk.bf16.vlgmr.msra.gmra.mrb[4].mxu1 %vm214_vm2, %v301_v35 }
 0x3c3   :  { %2077 = vmatpush3.xpose.msk.msra.mxu1 %vm214_vm2, %v405_v31  ;;  %2078 = vmatprep.mubr.msk.f32.mxu1 %vm2475_vm1, %v2474_v8 }
 0x3c4   :  { %2093 = vmatprep.subr.mxu1 %v2474_v8 }
 0x3ca   :  { %2079 = vmatmul.mubr.msk.f32.vlgmr.msra.gmra.mrb[2].mxu1 %vm214_vm2, %v403_v36 }
 0x3cb   :  { %2094 = vmatpush3.xpose.msk.msra.mxu1 %vm214_vm2, %v593_v37  ;;  %2095 = vmatprep.mubr.msk.f32.mxu1 %vm2475_vm1, %v2474_v8 }
 0x3cc   :  { %2098 = vmatprep.subr.bf16.mxu1 %v2474_v8 }
 0x3ce   :  { %2096 = vmatmul.mubr.msk.f32.vlgmr.msra.gmra.mrb[8].mxu1 %vm214_vm2, %v591_v38 }
 0x3cf   :  { %2100 = vmatprep.mubr.msk.bf16.mxu1 %vm2475_vm1, %v2474_v8 }
 0x495   :  { %v347_v42 = vpop.f32.mrb[4].mxu1 }
 0x496   :  { %v353_v43 = vpack.c.bf16 %v347_v42, %v347_v42  ;;  %v2068_v44 = vpop.f32.mrb[5].mxu1 }
 0x497   :  { %v350_v45 = vpop.f32.mrb[6].mxu1 }
 0x498   :  { %v2069_v46 = vpop.f32.mrb[7].mxu1  ;;  %2073 = vmatmul.mubr.msk.bf16.vlgmr.msra.gmra.mrb[4].mxu0 %vm214_vm2, %v353_v43 }
 0x499   :  { %2083 = vmatprep.mubr.msk.bf16.mxu0 %vm2475_vm1, %v2474_v8 }
 0x49d   :  { %v2688_v47 = vpop.f32.mrb[2].mxu1 }
 0x49e   :  { %v2080_v48 = vpop.f32.mrb[3].mxu1 }
 0x4a1   :  { %v664_v49 = vpop.f32.mrb[8].mxu1 }
 0x4a2   :  { %v668_v50 = vmul.f32 %v664_v49, %v2659_v21  ;;  %v2097_v51 = vpop.f32.mrb[9].mxu1 }
 0x4a4   :  { %v669_v52 = vsel %vm214_vm2, %v668_v50, -inf }
 0x4a5   :  { %670 = vmax.xlane.f32.xlu0 %v669_v52 }
 0x4bb   :  { %681 = vrot.lane.b32.xlu0 %v2644_v11, %s2481_s14 }
 0x4bf   :  { %780 = vrot.lane.b32.xlu0 %v2638_v10, %s2482_s15 }
 0x4c3   :  { %778 = vrot.lane.b32.xlu0 %v2638_v10, %s2483_s16 }
 0x532   :  { %v671_v53 = vpop.xlane.xlu0 %670 }
 0x533   :  { %v672_v54 = vsub.f32 %v668_v50, %v671_v53 }
 0x535   :  { %v673_v55 = vmul.f32 1.442695, %v672_v54 }
 0x536   :  { %v682_v56 = vpop.permute.xlu0 %681 }
 0x537   :  { %2289 = vpow2.f32 %v673_v55  ;;  %v687_v57 = vsel %vm309_vm3, %v682_v56, 0 }
 0x538   :  { %2099 = vmatpush3.bf16.msra.mxu1 %v687_v57 }
 0x539   :  { %2110 = vmatprep.subr.mxu1 %v2474_v8 }
 0x53a   :  { %v781_v0 = vpop.permute.xlu0 %780 }
 0x53e   :  { %v779_v2 = vpop.permute.xlu0 %778 }
 0x541   :  { %v2290_v58 = vpop.eup %2289 }
 0x542   :  { %v675_v59 = vsel %vm214_vm2, %v2290_v58, 0.0 }
 0x543   :  { %676 = vadd.xlane.f32.xlu1 %v675_v59 }
 0x554   :  { %869 = vrot.lane.b32.xlu1 %v2644_v11, %s2484_s18 }
 0x5d0   :  { %v677_v60 = vpop.xlane.xlu1 %676 }
 0x5d1   :  { %2291 = vrcp.f32 %v677_v60 }
 0x5d4   :  { %v870_v1 = vpop.permute.xlu1 %869 }
 0x5d5   :  { %v875_v3 = vsel %vm309_vm3, %v870_v1, 0 }
 0x5db   :  { %v2292_v61 = vpop.eup %2291 }
 0x5dc   :  { %v679_v62 = vmul.f32 %v2292_v61, %v2290_v58 }
 0x5de   :  { %v680_v63 = vpack.c.bf16 %v679_v62, %v679_v62 }
 0x5e0   :  { %2101 = vmatmul.mubr.msk.bf16.vlgmr.msra.gmra.mrb[12].mxu1 %vm214_vm2, %v680_v63 }
 0x5e1   :  { %2111 = vmatpush3.xpose.msk.msra.mxu1 %vm214_vm2, %v781_v0  ;;  %2112 = vmatprep.mubr.msk.f32.mxu1 %vm2475_vm1, %v2474_v8 }
 0x5e2   :  { %2115 = vmatprep.subr.bf16.mxu1 %v2474_v8 }
 0x5e8   :  { %2113 = vmatmul.mubr.msk.f32.vlgmr.msra.gmra.mrb[10].mxu1 %vm214_vm2, %v779_v2 }
 0x5e9   :  { %2116 = vmatpush3.bf16.msra.mxu1 %v875_v3  ;;  %2117 = vmatprep.mubr.msk.bf16.mxu1 %vm2475_vm1, %v2474_v8 }
 0x5ea   :  { %2127 = vmatprep.subr.mxu1 %v2474_v8 }
 0x6b3   :  { %v2713_v4 = vpop.f32.mrb[12].mxu1 }
 0x6b4   :  { %v2102_v6 = vpop.f32.mrb[13].mxu1 }
 0x6b5   :  { %v726_v10 = vpop.f32.mrb[14].mxu1 }
 0x6b6   :  { %v2103_v12 = vpop.f32.mrb[15].mxu1  ;;  %v480_v10 = vmul.f32 %v2688_v47, %v2659_v21 }
 0x6bb   :  { %v852_v13 = vpop.f32.mrb[10].mxu1 }
 0x6bc   :  { %v856_v14 = vmul.f32 %v852_v13, %v2659_v21  ;;  %v2114_v15 = vpop.f32.mrb[11].mxu1  ;;  %v481_v13 = vsel %vm214_vm2, %v480_v10, -inf }
 0x6be   :  { %v857_v16 = vsel %vm214_vm2, %v856_v14, -inf }
 0x6bf   :  { %858 = vmax.xlane.f32.xlu0 %v857_v16 }
 0x6d5   :  { %1098 = vrot.lane.b32.xlu0 %v2719_v17, %s2469_s1  ;;  %s2485_s1 = smov 56  }
 0x74c   :  { %v859_v18 = vpop.xlane.xlu0 %858 }
 0x74d   :  { %v860_v19 = vsub.f32 %v856_v14, %v859_v18 }
 0x74f   :  { %v861_v20 = vmul.f32 1.442695, %v860_v19 }
 0x750   :  { %v1099_v29 = vpop.permute.xlu0 %1098 }
 0x751   :  { %2293 = vpow2.f32 %v861_v20  ;;  %v1104_v30 = vsel %vm309_vm3, %v1099_v29, 0 }
 0x75b   :  { %v2294_v22 = vpop.eup %2293 }
 0x75c   :  { %v863_v23 = vsel %vm214_vm2, %v2294_v22, 0.0 }
 0x75d   :  { %864 = vadd.xlane.f32.xlu1 %v863_v23 }
 0x76e   :  { %1007 = vrot.lane.b32.xlu1 %v2636_v9, %s2476_s8 }
 0x7ea   :  { %v865_v24 = vpop.xlane.xlu1 %864 }
 0x7eb   :  { %2295 = vrcp.f32 %v865_v24 }
 0x7ee   :  { %v1008_v28 = vpop.permute.xlu1 %1007 }
 0x7f5   :  { %v2296_v25 = vpop.eup %2295 }
 0x7f6   :  { %v867_v26 = vmul.f32 %v2296_v25, %v2294_v22 }
 0x7f8   :  { %v868_v27 = vpack.c.bf16 %v867_v26, %v867_v26 }
 0x7fa   :  { %2118 = vmatmul.mubr.msk.bf16.vlgmr.msra.gmra.mrb[16].mxu1 %vm214_vm2, %v868_v27 }
 0x7fb   :  { %2128 = vmatpush3.xpose.msk.msra.mxu1 %vm214_vm2, %v1008_v28  ;;  %2129 = vmatprep.mubr.msk.f32.mxu1 %vm2475_vm1, %v2474_v8 }
 0x7fc   :  { %2132 = vmatprep.subr.bf16.mxu1 %v2474_v8 }
 0x802   :  { %2130 = vmatmul.mubr.msk.f32.vlgmr.msra.gmra.mrb[20].mxu1 %vm214_vm2, %v2636_v9 }
 0x803   :  { %2133 = vmatpush3.bf16.msra.mxu1 %v1104_v30  ;;  %2134 = vmatprep.mubr.msk.bf16.mxu1 %vm2475_vm1, %v2474_v8 }
 0x804   :  { %2144 = vmatprep.subr.mxu1 %v2474_v8 }
 0x8cd   :  { %v2737_v31 = vpop.f32.mrb[16].mxu1 }
 0x8ce   :  { %v2119_v32 = vpop.f32.mrb[17].mxu1 }
 0x8cf   :  { %v914_v33 = vpop.f32.mrb[18].mxu1 }
 0x8d0   :  { %v2120_v34 = vpop.f32.mrb[19].mxu1 }
 0x8d5   :  { %v1079_v35 = vpop.f32.mrb[20].mxu1 }
 0x8d6   :  { %v1083_v36 = vmul.f32 %v1079_v35, %v2659_v21  ;;  %v2131_v37 = vpop.f32.mrb[21].mxu1 }
 0x8d8   :  { %v1084_v38 = vsel %vm214_vm2, %v1083_v36, -inf }
 0x8d9   :  { %1085 = vmax.xlane.f32.xlu1 %v1084_v38 }
 0x8ea   :  { %1383 = vrot.lane.b32.xlu1 %v2636_v9, %s2480_s10 }
 0x966   :  { %v1086_v39 = vpop.xlane.xlu1 %1085 }
 0x967   :  { %v1087_v40 = vsub.f32 %v1083_v36, %v1086_v39 }
 0x969   :  { %v1088_v41 = vmul.f32 1.442695, %v1087_v40 }
 0x96a   :  { %v1384_v52 = vpop.permute.xlu1 %1383 }
 0x96b   :  { %2297 = vpow2.f32 %v1088_v41 }
 0x975   :  { %v2298_v42 = vpop.eup %2297 }
 0x976   :  { %v1090_v43 = vsel %vm214_vm2, %v2298_v42, 0.0 }
 0x977   :  { %1091 = vadd.xlane.f32.xlu0 %v1090_v43 }
 0x98d   :  { %1197 = vrot.lane.b32.xlu0 %v2636_v9, %s2477_s30 }
 0x991   :  { %1195 = vrot.lane.b32.xlu0 %v2636_v9, %s2478_s11 }
 0x995   :  { %1385 = vrot.lane.b32.xlu0 %v2636_v9, %s2479_s13 }
 0xa04   :  { %v1092_v44 = vpop.xlane.xlu0 %1091 }
 0xa05   :  { %2299 = vrcp.f32 %v1092_v44 }
 0xa08   :  { %v1198_v48 = vpop.permute.xlu0 %1197 }
 0xa0c   :  { %v1196_v50 = vpop.permute.xlu0 %1195 }
 0xa0f   :  { %v2300_v45 = vpop.eup %2299 }
 0xa10   :  { %v1094_v46 = vmul.f32 %v2300_v45, %v2298_v42  ;;  %v1386_v51 = vpop.permute.xlu0 %1385 }
 0xa12   :  { %v1095_v49 = vpack.c.bf16 %v1094_v46, %v1094_v46 }
 0xa14   :  { %2135 = vmatmul.mubr.msk.bf16.vlgmr.msra.gmra.mrb[24].mxu1 %vm214_vm2, %v1095_v49  ;;  %v208_v49 = vld [vmem:[#allocation7 + $0x8] sm:$0xff] }
 0xa15   :  { %2145 = vmatpush3.xpose.msk.msra.mxu1 %vm214_vm2, %v1198_v48  ;;  %2146 = vmatprep.mubr.msk.f32.mxu1 %vm2475_vm1, %v2474_v8 }
 0xa16   :  { %2161 = vmatprep.subr.mxu1 %v2474_v8 }
 0xa1c   :  { %2147 = vmatmul.mubr.msk.f32.vlgmr.msra.gmra.mrb[22].mxu1 %vm214_vm2, %v1196_v50  ;;  %v542_v50 = vpack.c.bf16 %v208_v49, %v208_v49 }
 0xa1d   :  { %2162 = vmatpush3.xpose.msk.msra.mxu1 %vm214_vm2, %v1386_v51  ;;  %2163 = vmatprep.mubr.msk.f32.mxu1 %vm2475_vm1, %v2474_v8 }
 0xa1e   :  { %2166 = vmatprep.subr.bf16.mxu1 %v2474_v8  ;;  %v547_v51 = vsel %vm309_vm3, %v542_v50, 0 }
 0xa20   :  { %2164 = vmatmul.mubr.msk.f32.vlgmr.msra.gmra.mrb[28].mxu1 %vm214_vm2, %v1384_v52 }
 0xa21   :  { %2168 = vmatprep.mubr.msk.bf16.mxu1 %vm2475_vm1, %v2474_v8 }
 0xae7   :  { %v2763_v53 = vpop.f32.mrb[24].mxu1 }
 0xae8   :  { %v2136_v54 = vpop.f32.mrb[25].mxu1 }
 0xae9   :  { %v1143_v55 = vpop.f32.mrb[26].mxu1 }
 0xaea   :  { %v2137_v56 = vpop.f32.mrb[27].mxu1 }
 0xaeb   :  { %v209_v56 = vld [vmem:[#allocation7 + $0x10] sm:$0xff] }
 0xaef   :  { %v1269_v57 = vpop.f32.mrb[22].mxu1 }
 0xaf0   :  { %v2148_v58 = vpop.f32.mrb[23].mxu1  ;;  %v1273_v14 = vmul.f32 %v1269_v57, %v2659_v21 }
 0xaf2   :  { %v1274_v15 = vsel %vm214_vm2, %v1273_v14, -inf }
 0xaf3   :  { %v1457_v59 = vpop.f32.mrb[28].mxu1 }
 0xaf4   :  { %v1461_v60 = vmul.f32 %v1457_v59, %v2659_v21  ;;  %v2165_v61 = vpop.f32.mrb[29].mxu1 }
 0xaf6   :  { %v1462_v62 = vsel %vm214_vm2, %v1461_v60, -inf }
 0xaf7   :  { %1463 = vmax.xlane.f32.xlu0 %v1462_v62 }
 0xb0d   :  { %1474 = vrot.lane.b32.xlu0 %v2719_v17, %s2481_s14 }
 0xb11   :  { %1573 = vrot.lane.b32.xlu0 %v2636_v9, %s2482_s15 }
 0xb84   :  { %v1464_v63 = vpop.xlane.xlu0 %1463 }
 0xb85   :  { %v1465_v0 = vsub.f32 %v1461_v60, %v1464_v63 }
 0xb87   :  { %v1466_v1 = vmul.f32 1.442695, %v1465_v0  ;;  %v210_v0 = vld [vmem:[#allocation7 + $0x18] sm:$0xff] }
 0xb88   :  { %v1475_v2 = vpop.permute.xlu0 %1474 }
 0xb89   :  { %2301 = vpow2.f32 %v1466_v1  ;;  %v1480_v3 = vsel %vm309_vm3, %v1475_v2, 0  ;;  %v918_v2 = vpack.c.bf16 %v210_v0, %v210_v0 }
 0xb8a   :  { %2167 = vmatpush3.bf16.msra.mxu1 %v1480_v3  ;;  %v729_v3 = vpack.c.bf16 %v2713_v4, %v2713_v4  ;;  %v1146_v4 = vpack.c.bf16 %v2763_v53, %v2763_v53 }
 0xb8b   :  { %2178 = vmatprep.subr.mxu1 %v2474_v8 }
 0xb8c   :  { %v1574_v25 = vpop.permute.xlu0 %1573 }
 0xb93   :  { %v2302_v6 = vpop.eup %2301 }
 0xb94   :  { %v1468_v12 = vsel %vm214_vm2, %v2302_v6, 0.0 }
 0xb95   :  { %1469 = vadd.xlane.f32.xlu1 %v1468_v12 }
 0xb99   :  { %482 = vmax.xlane.f32.xlu1 %v481_v13  ;;  %v917_v13 = vpack.c.bf16 %v2737_v31, %v2737_v31 }
 0xbaa   :  { %1571 = vrot.lane.b32.xlu1 %v2636_v9, %s2483_s16 }
 0xbae   :  { %493 = vrot.lane.b32.xlu1 %v2644_v11, %s2485_s1 }
 0xbd2   :  { %1275 = vmax.xlane.f32.xlu1 %v1274_v15 }
 0xbe3   :  { %1662 = vrot.lane.b32.xlu1 %v2719_v17, %s2484_s18 }
 0xc22   :  { %v1470_v47 = vpop.xlane.xlu1 %1469 }
 0xc23   :  { %2303 = vrcp.f32 %v1470_v47 }
 0xc26   :  { %v483_v16 = vpop.xlane.xlu1 %482 }
 0xc27   :  { %v484_v18 = vsub.f32 %v480_v10, %v483_v16  ;;  %v1002_v10 = vld [vmem:[#allocation7 + $0x20] sm:$0xff] }
 0xc28   :  { %v1147_v12 = vpack.c.bf16 %v1002_v10, %v1002_v10 }
 0xc29   :  { %v485_v19 = vmul.f32 1.442695, %v484_v18 }
 0xc2a   :  { %v1572_v20 = vpop.permute.xlu1 %1571 }
 0xc2b   :  { %2305 = vpow2.f32 %v485_v19 }
 0xc2d   :  { %v2304_v9 = vpop.eup %2303 }
 0xc2e   :  { %v1472_v22 = vmul.f32 %v2304_v9, %v2302_v6  ;;  %v494_v23 = vpop.permute.xlu1 %493  ;;  %v923_v6 = vsel %vm309_vm3, %v918_v2, 0 }
 0xc2f   :  { %v499_v11 = vsel %vm309_vm3, %v494_v23, 0  ;;  %v1003_v23 = vld [vmem:[#allocation7 + $0x28] sm:$0xff] }
 0xc30   :  { %2082 = vmatpush3.bf16.msra.mxu0 %v499_v11  ;;  %v1473_v24 = vpack.c.bf16 %v1472_v22, %v1472_v22 }
 0xc31   :  { %2087 = vmatprep.subr.bf16.mxu0 %v2474_v8 }
 0xc32   :  { %2169 = vmatmul.mubr.msk.bf16.vlgmr.msra.gmra.mrb[32].mxu1 %vm214_vm2, %v1473_v24 }
 0xc33   :  { %2179 = vmatpush3.xpose.msk.msra.mxu1 %vm214_vm2, %v1574_v25  ;;  %2180 = vmatprep.mubr.msk.f32.mxu1 %vm2475_vm1, %v2474_v8  ;;  %v1335_v25 = vpack.c.bf16 %v1003_v23, %v1003_v23 }
 0xc34   :  { %2183 = vmatprep.subr.bf16.mxu1 %v2474_v8 }
 0xc35   :  { %v2306_v26 = vpop.eup %2305 }
 0xc36   :  { %v487_v27 = vsel %vm214_vm2, %v2306_v26, 0.0 }
 0xc37   :  { %488 = vadd.xlane.f32.xlu0 %v487_v27 }
 0xc3a   :  { %2181 = vmatmul.mubr.msk.f32.vlgmr.msra.gmra.mrb[30].mxu1 %vm214_vm2, %v1572_v20 }
 0xc3b   :  { %2185 = vmatprep.mubr.msk.bf16.mxu1 %vm2475_vm1, %v2474_v8 }
 0xc5f   :  { %v1276_v28 = vpop.xlane.xlu1 %1275 }
 0xc60   :  { %v1277_v36 = vsub.f32 %v1273_v14, %v1276_v28  ;;  %v1152_v14 = vsel %vm309_vm3, %v1147_v12, 0 }
 0xc62   :  { %v1278_v37 = vmul.f32 1.442695, %v1277_v36 }
 0xc63   :  { %v1663_v29 = vpop.permute.xlu1 %1662 }
 0xc64   :  { %v1668_v30 = vsel %vm309_vm3, %v1663_v29, 0 }
 0xc65   :  { %2184 = vmatpush3.bf16.msra.mxu1 %v1668_v30  ;;  %v1340_v30 = vsel %vm309_vm3, %v1335_v25, 0 }
 0xc66   :  { %2195 = vmatprep.subr.bf16.mxu1 %v2474_v8 }
 0xcc4   :  { %v489_v32 = vpop.xlane.xlu0 %488 }
 0xcc5   :  { %2307 = vrcp.f32 %v489_v32 }
 0xcc6   :  { %2309 = vpow2.f32 %v1278_v37 }
 0xccf   :  { %v2308_v33 = vpop.eup %2307 }
 0xcd0   :  { %v491_v34 = vmul.f32 %v2308_v33, %v2306_v26  ;;  %v2310_v46 = vpop.eup %2309 }
 0xcd1   :  { %v1280_v48 = vsel %vm214_vm2, %v2310_v46, 0.0 }
 0xcd2   :  { %v492_v35 = vpack.c.bf16 %v491_v34, %v491_v34 }
 0xcd4   :  { %2084 = vmatmul.mubr.msk.bf16.vlgmr.msra.gmra.mrb[8].mxu0 %vm214_vm2, %v492_v35 }
 0xcd5   :  { %2089 = vmatprep.mubr.msk.bf16.mxu0 %vm2475_vm1, %v2474_v8  ;;  %2088 = vmatpush3.bf16.msra.mxu0 %v547_v51 }
 0xcd6   :  { %2104 = vmatprep.subr.bf16.mxu0 %v2474_v8 }
 0xd05   :  { %v2801_v38 = vpop.f32.mrb[32].mxu1 }
 0xd06   :  { %v2170_v39 = vpop.f32.mrb[33].mxu1 }
 0xd07   :  { %v1519_v40 = vpop.f32.mrb[34].mxu1 }
 0xd08   :  { %v2171_v41 = vpop.f32.mrb[35].mxu1 }
 0xd09   :  { %v1005_v41 = vld [vmem:[#allocation7 + $0x38] sm:$0xff] }
 0xd0d   :  { %v1645_v42 = vpop.f32.mrb[30].mxu1 }
 0xd0e   :  { %v1649_v43 = vmul.f32 %v1645_v42, %v2659_v21  ;;  %v2182_v44 = vpop.f32.mrb[31].mxu1  ;;  %v730_v21 = vpack.c.bf16 %v209_v56, %v209_v56 }
 0xd10   :  { %v1650_v45 = vsel %vm214_vm2, %v1649_v43, -inf  ;;  %v735_v60 = vsel %vm309_vm3, %v730_v21, 0 }
 0xd11   :  { %1651 = vmax.xlane.f32.xlu0 %v1650_v45  ;;  %v1711_v45 = vpack.c.bf16 %v1005_v41, %v1005_v41 }
 0xd13   :  { %v1716_v49 = vsel %vm309_vm3, %v1711_v45, 0 }
 0xd15   :  { %1281 = vadd.xlane.f32.xlu0 %v1280_v48  ;;  %v1522_v48 = vpack.c.bf16 %v2801_v38, %v2801_v38 }
 0xd9e   :  { %v1652_v52 = vpop.xlane.xlu0 %1651 }
 0xd9f   :  { %v1653_v54 = vsub.f32 %v1649_v43, %v1652_v52 }
 0xda1   :  { %v1654_v55 = vmul.f32 1.442695, %v1653_v54 }
 0xda2   :  { %v1282_v31 = vpop.xlane.xlu0 %1281 }
 0xda3   :  { %2311 = vpow2.f32 %v1654_v55 }
 0xda4   :  { %2313 = vrcp.f32 %v1282_v31 }
 0xda7   :  { %v535_v57 = vpop.f32.mrb[8].mxu0 }
 0xda8   :  { %v541_v58 = vpack.c.bf16 %v535_v57, %v535_v57  ;;  %v2085_v59 = vpop.f32.mrb[9].mxu0 }
 0xda9   :  { %v538_v61 = vpop.f32.mrb[10].mxu0 }
 0xdaa   :  { %v2086_v62 = vpop.f32.mrb[11].mxu0  ;;  %2090 = vmatmul.mubr.msk.bf16.vlgmr.msra.gmra.mrb[4].mxu0 %vm214_vm2, %v541_v58 }
 0xdab   :  { %2105 = vmatpush3.bf16.msra.mxu0 %v735_v60  ;;  %2106 = vmatprep.mubr.msk.bf16.mxu0 %vm2475_vm1, %v2474_v8 }
 0xdac   :  { %2121 = vmatprep.subr.bf16.mxu0 %v2474_v8 }
 0xdad   :  { %v2312_v63 = vpop.eup %2311 }
 0xdae   :  { %v1656_v1 = vsel %vm214_vm2, %v2312_v63, 0.0  ;;  %v2314_v15 = vpop.eup %2313 }
 0xdaf   :  { %1657 = vadd.xlane.f32.xlu0 %v1656_v1  ;;  %v1284_v16 = vmul.f32 %v2314_v15, %v2310_v46 }
 0xdb1   :  { %v1285_v20 = vpack.c.bf16 %v1284_v16, %v1284_v16 }
 0xdb6   :  { %2107 = vmatmul.mubr.msk.bf16.vlgmr.msra.gmra.mrb[4].mxu0 %vm214_vm2, %v729_v3 }
 0xdb7   :  { %2122 = vmatpush3.bf16.msra.mxu0 %v923_v6  ;;  %2123 = vmatprep.mubr.msk.bf16.mxu0 %vm2475_vm1, %v2474_v8 }
 0xdb8   :  { %2138 = vmatprep.subr.bf16.mxu0 %v2474_v8 }
 0xdc2   :  { %2124 = vmatmul.mubr.msk.bf16.vlgmr.msra.gmra.mrb[4].mxu0 %vm214_vm2, %v917_v13 }
 0xdc3   :  { %2139 = vmatpush3.bf16.msra.mxu0 %v1152_v14  ;;  %2140 = vmatprep.mubr.msk.bf16.mxu0 %vm2475_vm1, %v2474_v8 }
 0xdc4   :  { %2149 = vmatprep.subr.bf16.mxu0 %v2474_v8 }
 0xdc5   :  { %1286 = vrot.lane.b32.xlu0 %v2719_v17, %s2485_s1 }
 0xdca   :  { %2141 = vmatmul.mubr.msk.bf16.vlgmr.msra.gmra.mrb[12].mxu0 %vm214_vm2, %v1146_v4 }
 0xdcb   :  { %2151 = vmatprep.mubr.msk.bf16.mxu0 %vm2475_vm1, %v2474_v8 }
 0xe3c   :  { %v1658_v47 = vpop.xlane.xlu0 %1657 }
 0xe3d   :  { %2315 = vrcp.f32 %v1658_v47 }
 0xe40   :  { %v1287_v18 = vpop.permute.xlu0 %1286 }
 0xe41   :  { %v1292_v19 = vsel %vm309_vm3, %v1287_v18, 0 }
 0xe42   :  { %2150 = vmatpush3.bf16.msra.mxu0 %v1292_v19 }
 0xe43   :  { %2155 = vmatprep.subr.bf16.mxu0 %v2474_v8 }
 0xe45   :  { %2152 = vmatmul.mubr.msk.bf16.vlgmr.msra.gmra.mrb[16].mxu0 %vm214_vm2, %v1285_v20 }
 0xe46   :  { %2157 = vmatprep.mubr.msk.bf16.mxu0 %vm2475_vm1, %v2474_v8  ;;  %2156 = vmatpush3.bf16.msra.mxu0 %v1340_v30 }
 0xe47   :  { %v2316_v17 = vpop.eup %2315  ;;  %2172 = vmatprep.subr.bf16.mxu0 %v2474_v8 }
 0xe48   :  { %v1660_v53 = vmul.f32 %v2316_v17, %v2312_v63 }
 0xe4a   :  { %v1661_v9 = vpack.c.bf16 %v1660_v53, %v1660_v53  ;;  %v2283_v53 = vld [vmem:[#allocation8] sm:$0xff]  }
 0xe4c   :  { %2186 = vmatmul.mubr.msk.bf16.vlgmr.msra.gmra.mrb[36].mxu1 %vm214_vm2, %v1661_v9 }
 0xe4d   :  { %2199 = vmatprep.mubr.msk.bf16.mxu1 %vm2475_vm1, %v2474_v8  ;;  %2196 = vmatpush3.bf16.msra.mxu1 %v2283_v53 }
 0xe4e   :  { %2197 = vmatprep.subr.bf16.mxu1 %v2474_v8 }
 0xe95   :  { %v959_v22 = vpop.f32.mrb[4].mxu0 }
 0xe96   :  { %v2844_v11 = vadd.f32 %v959_v22, %v2622_v5  ;;  %v2125_v24 = vpop.f32.mrb[5].mxu0  ;;  %v1004_v5 = vld [vmem:[#allocation7 + $0x30] sm:$0xff] }
 0xe97   :  { %v962_v26 = vpop.f32.mrb[6].mxu0  ;;  %v1523_v33 = vpack.c.bf16 %v1004_v5, %v1004_v5  ;;  %v2284_v24 = vld [vmem:[#allocation8 + $0x8] sm:$0xff]  }
 0xe98   :  { %v2126_v27 = vpop.f32.mrb[7].mxu0  ;;  %v966_v28 = vsel %vm106_vm0, %v2844_v11, 0.0  ;;  %v977_v29 = vmul.f32 %v2844_v11, %v2844_v11  ;;  %2198 = vmatpush3.bf16.msra.mxu1 %v2284_v24 }
 0xe99   :  { %967 = vadd.xlane.f32.xlu0 %v966_v28  ;;  %v1528_v37 = vsel %vm309_vm3, %v1523_v33, 0  ;;  %v198_v33 = vld [vmem:[%s2920_s5] sm:$0xff] }
 0xe9a   :  { %v978_v32 = vsel %vm106_vm0, %v977_v29, 0.0 }
 0xe9b   :  { %979 = vadd.xlane.f32.xlu1 %v978_v32 }
 0xf18   :  { %v1328_v34 = vpop.f32.mrb[16].mxu0 }
 0xf19   :  { %v1334_v35 = vpack.c.bf16 %v1328_v34, %v1328_v34  ;;  %v2153_v36 = vpop.f32.mrb[17].mxu0 }
 0xf1a   :  { %v1331_v39 = vpop.f32.mrb[18].mxu0 }
 0xf1b   :  { %v2154_v40 = vpop.f32.mrb[19].mxu0  ;;  %2158 = vmatmul.mubr.msk.bf16.vlgmr.msra.gmra.mrb[12].mxu0 %vm214_vm2, %v1334_v35  ;;  %v199_v39 = vld [vmem:[%s2921_s6] sm:$0xff] }
 0xf1c   :  { %2173 = vmatpush3.bf16.msra.mxu0 %v1528_v37  ;;  %2174 = vmatprep.mubr.msk.bf16.mxu0 %vm2475_vm1, %v2474_v8 }
 0xf1d   :  { %2189 = vmatprep.subr.bf16.mxu0 %v2474_v8 }
 0xf1f   :  { %v1704_v42 = vpop.f32.mrb[36].mxu1 }
 0xf20   :  { %v2187_v43 = vpop.f32.mrb[37].mxu1  ;;  %v1710_v38 = vpack.c.bf16 %v1704_v42, %v1704_v42 }
 0xf21   :  { %v1707_v44 = vpop.f32.mrb[38].mxu1 }
 0xf22   :  { %v2188_v46 = vpop.f32.mrb[39].mxu1 }
 0xf26   :  { %v968_v50 = vpop.xlane.xlu0 %967 }
 0xf27   :  { %v969_v51 = vrot.slane %v968_v50, 4  ;;  %2175 = vmatmul.mubr.msk.bf16.vlgmr.msra.gmra.mrb[12].mxu0 %vm214_vm2, %v1522_v48 }
 0xf28   :  { %v980_v52 = vpop.xlane.xlu1 %979  ;;  %2190 = vmatpush3.bf16.msra.mxu0 %v1716_v49  ;;  %2191 = vmatprep.mubr.msk.bf16.mxu0 %vm2475_vm1, %v2474_v8 }
 0xf29   :  { %v970_v54 = vadd.f32 %v969_v51, %v968_v50  ;;  %v981_v55 = vrot.slane %v980_v52, 4 }
 0xf2b   :  { %v971_v56 = vrot.slane %v970_v54, 2  ;;  %v982_v21 = vadd.f32 %v981_v55, %v980_v52 }
 0xf2d   :  { %v983_v57 = vrot.slane %v982_v21, 2  ;;  %v972_v58 = vadd.f32 %v971_v56, %v970_v54 }
 0xf2f   :  { %v973_v59 = vrot.slane %v972_v58, 1  ;;  %v984_v60 = vadd.f32 %v983_v57, %v982_v21 }
 0xf31   :  { %v974_v61 = vadd.f32 %v973_v59, %v972_v58  ;;  %v985_v62 = vrot.slane %v984_v60, 1 }
 0xf33   :  { %2237 = vpush %v974_v61  ;;  %2192 = vmatmul.mubr.msk.bf16.vlgmr.msra.gmra.mrb[12].mxu0 %vm214_vm2, %v1710_v38  ;;  %v986_v63 = vadd.f32 %v985_v62, %v984_v60 }
 0xf35   :  { %2239 = vpush %v986_v63 }
 0xf64   :  { %s2238_s0 = spop %2237 }
 0xf65   :  { %s2865_s17 = smul.f32 0.00390625, %s2238_s0 }
 0xf66   :  { %s2240_s20 = spop %2239 }
 0xf67   :  { %s989_s23 = smul.f32 %s2865_s17, %s2865_s17  ;;  %v991_v8 = vstv %s2865_s17 }
 0xf68   :  { %s988_s24 = smul.f32 0.00390625, %s2240_s20  ;;  %v992_v30 = vsub.f32 %v2844_v11, %v991_v8  ;;  %v1987_v11 = vld [vmem:[%s2919_s4] ss:$0 sm:$0xff] }
 0xf69   :  { %v200_v8 = vld [vmem:[%s2922_s7] sm:$0xff] }
 0xf6a   :  { %s990_s25 = ssub.f32 %s988_s24, %s989_s23 }
 0xf6c   :  { %s993_s26 = sadd.f32 1e-05, %s990_s25 }
 0xf6e   :  { %v994_v0 = vstv %s993_s26 }
 0xf6f   :  { %2317 = vrsqrt.f32 %v994_v0 }
 0xf79   :  { %v2318_v1 = vpop.eup %2317 }
 0xf7a   :  { %2241 = vpush %v2318_v1 }
 0xfab   :  { %s2242_s27 = spop %2241 }
 0xfac   :  { %v997_v29 = vstv %s2242_s27 }
 0xfad   :  { %v998_v5 = vmul.f32 %v997_v29, %v992_v30 }
 0xfaf   :  { %v999_v36 = vmul.f32 %v998_v5, %v198_v33 }
 0xfb1   :  { %v1000_v41 = vadd.f32 %v999_v36, %v199_v39 }
0x1006   :  { %v1752_v2 = vpop.f32.mrb[12].mxu0 }
0x1007   :  { %v2212_v3 = vadd.f32 %v1752_v2, %v2626_v7  ;;  %v2193_v6 = vpop.f32.mrb[13].mxu0 }
0x1008   :  { %v1755_v10 = vpop.f32.mrb[14].mxu0 }
0x1009   :  { %v2194_v12 = vpop.f32.mrb[15].mxu0  ;;  %v1759_v13 = vsel %vm106_vm0, %v2212_v3, 0.0  ;;  %v1770_v14 = vmul.f32 %v2212_v3, %v2212_v3 }
0x100a   :  { %1760 = vadd.xlane.f32.xlu0 %v1759_v13 }
0x100b   :  { %v1771_v4 = vsel %vm106_vm0, %v1770_v14, 0.0 }
0x100e   :  { %1772 = vadd.xlane.f32.xlu0 %v1771_v4 }
0x1097   :  { %v1761_v31 = vpop.xlane.xlu0 %1760 }
0x1098   :  { %v1762_v15 = vrot.slane %v1761_v31, 4 }
0x109a   :  { %v1763_v47 = vadd.f32 %v1762_v15, %v1761_v31 }
0x109b   :  { %v1773_v16 = vpop.xlane.xlu0 %1772 }
0x109c   :  { %v1764_v18 = vrot.slane %v1763_v47, 2  ;;  %v1774_v19 = vrot.slane %v1773_v16, 4 }
0x109e   :  { %v1775_v20 = vadd.f32 %v1774_v19, %v1773_v16  ;;  %v1765_v17 = vadd.f32 %v1764_v18, %v1763_v47 }
0x10a0   :  { %v1776_v7 = vrot.slane %v1775_v20, 2  ;;  %v1766_v9 = vrot.slane %v1765_v17, 1 }
0x10a2   :  { %v1767_v22 = vadd.f32 %v1766_v9, %v1765_v17  ;;  %v1777_v23 = vadd.f32 %v1776_v7, %v1775_v20 }
0x10a4   :  { %2243 = vpush %v1767_v22  ;;  %v1778_v25 = vrot.slane %v1777_v23, 1 }
0x10a6   :  { %v1779_v26 = vadd.f32 %v1778_v25, %v1777_v23 }
0x10a8   :  { %2245 = vpush %v1779_v26 }
0x10d5   :  { %s2244_s28 = spop %2243 }
0x10d6   :  { %s1769_s3 = smul.f32 0.00390625, %s2244_s28 }
0x10d8   :  { %s1782_s12 = smul.f32 %s1769_s3, %s1769_s3  ;;  %v1784_v32 = vstv %s1769_s3 }
0x10d9   :  { %s2246_s29 = spop %2245  ;;  %v1785_v34 = vsub.f32 %v2212_v3, %v1784_v32  ;;  %v201_v32 = vld [vmem:[#allocation10] sm:$0xff] }
0x10da   :  { %s1781_s2 = smul.f32 0.00390625, %s2246_s29 }
0x10dc   :  { %s1783_s19 = ssub.f32 %s1781_s2, %s1782_s12  ;;  %s2486_s2 = smov [#allocation11]  }
0x10de   :  { %s1786_s8 = sadd.f32 1e-05, %s1783_s19  ;;  %s1938_s19 = sshll.u32 %s2486_s2, 4  ;;  %s1939_s19 = int_to_ptr.vmem [resolvable:$true] %s1938_s19 }
0x10df   :  { %p2440_p13 = scmp.lt.s32.totalorder %s1939_s19, %s1939_s19 }
0x10e0   :  { %v1787_v27 = vstv %s1786_s8  ;;  %s2435_s8 = scalar_lea.vmem %s1939_s19, 256 }
0x10e1   :  { %2319 = vrsqrt.f32 %v1787_v27  ;;  %p2436_p12 = scmp.ne.s32.totalorder %s1939_s19, %s2435_s8  ;;  %p2441_p0 = scmp.lt.s32.totalorder %s2435_s8, %s2435_s8 }
0x10e3   :  { %p2442_p1 = por %p2441_p0, %p2440_p13 }
0x10e5   :  { %p2443_p2 = pnand %p2442_p1, %p2436_p12 }
0x10eb   :  { %v2320_v28 = vpop.eup %2319 }
0x10ec   :  { %2247 = vpush %v2320_v28 }
0x111d   :  { %s2248_s13 = spop %2247 }
0x111e   :  { %v1790_v35 = vstv %s2248_s13 }
0x111f   :  { %v1791_v37 = vmul.f32 %v1790_v35, %v1785_v34 }
0x1121   :  { %v1792_v40 = vmul.f32 %v1791_v37, %v198_v33 }
0x1123   :  { %v1793_v42 = vadd.f32 %v1792_v40, %v199_v39 }
0x1125   :  { %v1794_v43 = vpack.c.bf16 %v1793_v42, %v1000_v41 }
0x1127   :  { %2200 = vmatmul.mubr.msk.bf16.vlgmr.msra.gmra.mrb[40].mxu1 %vm106_vm0, %v1794_v43 }
0x11fa   :  { %v1850_v44 = vpop.f32.mrb[40].mxu1 }
0x11fb   :  { %v1851_v45 = vadd.f32 %v1987_v11, %v1850_v44  ;;  %v2201_v46 = vpop.f32.mrb[41].mxu1 }
0x11fc   :  { %v1853_v48 = vpop.f32.mrb[42].mxu1 }
0x11fd   :  { %v1857_v49 = vmax.f32 %v1851_v45, 0.0  ;;  %v1854_v50 = vadd.f32 %v1987_v11, %v1853_v48  ;;  %v2202_v51 = vpop.f32.mrb[43].mxu1 }
0x11ff   :  { %v1859_v52 = vadd.f32 %v1857_v49, %v1000_v41  ;;  %v1858_v54 = vmax.f32 %v1854_v50, 0.0 }
0x1201   :  { %v2885_v55 = vadd.f32 %v1858_v54, %v1793_v42  ;;  %v1861_v56 = vsel %vm106_vm0, %v1859_v52, 0.0  ;;  %v1872_v21 = vmul.f32 %v1859_v52, %v1859_v52 }
0x1202   :  { %1862 = vadd.xlane.f32.xlu0 %v1861_v56 }
0x1203   :  { %v1873_v57 = vsel %vm106_vm0, %v1872_v21, 0.0  ;;  %v1907_v58 = vmul.f32 %v2885_v55, %v2885_v55  ;;  %v1896_v59 = vsel %vm106_vm0, %v2885_v55, 0.0 }
0x1204   :  { %1874 = vadd.xlane.f32.xlu1 %v1873_v57 }
0x1205   :  { %v1908_v60 = vsel %vm106_vm0, %v1907_v58, 0.0 }
0x1206   :  { %1897 = vadd.xlane.f32.xlu0 %v1896_v59 }
0x1208   :  { %1909 = vadd.xlane.f32.xlu1 %v1908_v60 }
0x128f   :  { %v1863_v38 = vpop.xlane.xlu0 %1862 }
0x1290   :  { %v1864_v61 = vrot.slane %v1863_v38, 4 }
0x1291   :  { %v1875_v62 = vpop.xlane.xlu1 %1874 }
0x1292   :  { %v1865_v63 = vadd.f32 %v1864_v61, %v1863_v38  ;;  %v1876_v0 = vrot.slane %v1875_v62, 4 }
0x1293   :  { %v1898_v31 = vpop.xlane.xlu0 %1897 }
0x1294   :  { %v1866_v1 = vrot.slane %v1865_v63, 2  ;;  %v1877_v2 = vadd.f32 %v1876_v0, %v1875_v62  ;;  %v1899_v47 = vrot.slane %v1898_v31, 4 }
0x1295   :  { %v1910_v15 = vpop.xlane.xlu1 %1909 }
0x1296   :  { %v1878_v3 = vrot.slane %v1877_v2, 2  ;;  %v1867_v6 = vadd.f32 %v1866_v1, %v1865_v63  ;;  %v1911_v16 = vrot.slane %v1910_v15, 4  ;;  %v1900_v18 = vadd.f32 %v1899_v47, %v1898_v31 }
0x1298   :  { %v1868_v10 = vrot.slane %v1867_v6, 1  ;;  %v1879_v12 = vadd.f32 %v1878_v3, %v1877_v2  ;;  %v1912_v19 = vadd.f32 %v1911_v16, %v1910_v15  ;;  %v1901_v20 = vrot.slane %v1900_v18, 2 }
0x129a   :  { %v1869_v13 = vadd.f32 %v1868_v10, %v1867_v6  ;;  %v1880_v14 = vrot.slane %v1879_v12, 1  ;;  %v1913_v17 = vrot.slane %v1912_v19, 2  ;;  %v1902_v7 = vadd.f32 %v1901_v20, %v1900_v18 }
0x129c   :  { %2249 = vpush %v1869_v13  ;;  %v1881_v4 = vadd.f32 %v1880_v14, %v1879_v12  ;;  %v1914_v9 = vadd.f32 %v1913_v17, %v1912_v19  ;;  %v1903_v22 = vrot.slane %v1902_v7, 1 }
0x129e   :  { %2251 = vpush %v1881_v4  ;;  %v1915_v23 = vrot.slane %v1914_v9, 1  ;;  %v1904_v25 = vadd.f32 %v1903_v22, %v1902_v7 }
0x12a0   :  { %v1916_v26 = vadd.f32 %v1915_v23, %v1914_v9 }
0x12cd   :  { %s2250_s4 = spop %2249 }
0x12ce   :  { %s1871_s5 = smul.f32 0.00390625, %s2250_s4 }
0x12cf   :  { %s2252_s6 = spop %2251 }
0x12d0   :  { %s1884_s18 = smul.f32 %s1871_s5, %s1871_s5  ;;  %v1886_v27 = vstv %s1871_s5 }
0x12d1   :  { %s1883_s1 = smul.f32 0.00390625, %s2252_s6  ;;  %v1887_v28 = vsub.f32 %v1859_v52, %v1886_v27 }
0x12d3   :  { %s1885_s0 = ssub.f32 %s1883_s1, %s1884_s18 }
0x12d5   :  { %s1888_s17 = sadd.f32 1e-05, %s1885_s0 }
0x12d7   :  { %v1889_v53 = vstv %s1888_s17 }
0x12d8   :  { %2321 = vrsqrt.f32 %v1889_v53 }
0x12e2   :  { %v2322_v24 = vpop.eup %2321 }
0x12e3   :  { %2253 = vpush %v2322_v24 }
0x12e4   :  { %2255 = vpush %v1904_v25 }
0x12e5   :  { %2257 = vpush %v1916_v26 }
0x1314   :  { %s2254_s20 = spop %2253 }
0x1315   :  { %v1892_v29 = vstv %s2254_s20  ;;  %s2256_s25 = spop %2255 }
0x1316   :  { %v1893_v30 = vmul.f32 %v1892_v29, %v1887_v28  ;;  %s1906_s26 = smul.f32 0.00390625, %s2256_s25  ;;  %s2258_s27 = spop %2257 }
0x1317   :  { %s1918_s28 = smul.f32 0.00390625, %s2258_s27 }
0x1318   :  { %v1894_v5 = vmul.f32 %v1893_v30, %v200_v8  ;;  %s1919_s3 = smul.f32 %s1906_s26, %s1906_s26  ;;  %v1921_v36 = vstv %s1906_s26 }
0x1319   :  { %v1922_v37 = vsub.f32 %v2885_v55, %v1921_v36 }
0x131a   :  { %v1895_v33 = vadd.f32 %v1894_v5, %v201_v32  ;;  %s1920_s12 = ssub.f32 %s1918_s28, %s1919_s3 }
0x131c   :  { %1931 = vst.msk [vmem:[#allocation11] sm:$0xff] %vm106_vm0, %v1895_v33  ;;  %s1923_s29 = sadd.f32 1e-05, %s1920_s12 }
0x131e   :  { %v1924_v34 = vstv %s1923_s29 }
0x131f   :  { %2323 = vrsqrt.f32 %v1924_v34 }
0x1329   :  { %v2324_v35 = vpop.eup %2323 }
0x132a   :  { %2259 = vpush %v2324_v35 }
0x135b   :  { %s2260_s7 = spop %2259 }
0x135c   :  { %v1927_v39 = vstv %s2260_s7 }
0x135d   :  { %v1928_v40 = vmul.f32 %v1927_v39, %v1922_v37 }
0x135f   :  { %v1929_v41 = vmul.f32 %v1928_v40, %v200_v8 }
0x1361   :  { %v1930_v42 = vadd.f32 %v1929_v41, %v201_v32 }
0x1363   :  { %1932 = vst.msk [vmem:[#allocation11 + $0x8] sm:$0xff] %vm106_vm0, %v1930_v42 }
0x1364   :  { %2446 = shalt.err (!%p2443_p2)
}
0x1365   :  { %s2447_s13 = scalar_lea.hbm %s2924_s9, 256 }
0x1366   :  { %p2448_p3 = scmp.ne.s32.totalorder %s2924_s9, %s2447_s13  ;;  %p2451_p4 = scmp.lt.u32.totalorder %s2447_s13, %s2924_s9 }
0x1368   :  { %p2453_p5 = pnand %p2451_p4, %p2448_p3 }
0x136a   :  { %2456 = shalt.err (!%p2453_p5)
}
0x136b   :  { %1944 = dma.vmem_to_hbm [thread:$0]  %s1939_s19, 256, %s2924_s9, [#allocation4], %s2467_s21, %s2467_s21, %s2468_s22  }
0x136c   :  { %2463 = dma.done.wait [#allocation4], 256  }
0x136d   :  { %2464 = vsyncadd [#allocation4], 4294967040 }
0x136e   :  { %1948 = vsyncpa [#allocation3], 1 }
0x136f   :  { %1949 = vsyncpa [#allocation6], 1 }
0x1370   :  { %1950 = vsyncpa [#allocation9], 1 }
0x1371   :  { %1951 = vsyncpa [#allocation4], 1 }

</bundles_post_ra>
